<compile_context>
chip_gen: v7x
topology: tpu7x:2x2x1
jax: 0.10.0
libtpu: 0.0.40
codegen_flags: <defaults>
</compile_context>

<pallas_src>
import jax
import jax.numpy as jnp
import numpy as np
from jax import lax
from jax.experimental import pallas as pl
from jax.experimental.pallas import tpu as pltpu

BN_EPS = 1e-5
_VMEM_LIMIT = 32 * 1024 * 1024      # <= physical VMEM on v5e/v6e (128 MiB) and v7x (64 MiB)
_TARGET_BLOCK_BYTES = 1 << 20       # ~1 MiB input block per grid step
_MAX_UNROLL = 8                     # static unroll threshold for the per-block sample loop


# ---------------------------------------------------------------------------
# Small host-side helpers
# ---------------------------------------------------------------------------
def _block_samples(n, per_sample_bytes):
    """Largest divisor of n whose per-step input block stays around ~1 MiB.

    Using an exact divisor keeps every grid step full, so the BN partial
    statistics never include padding rows.
    """
    cap = max(1, _TARGET_BLOCK_BYTES // max(per_sample_bytes, 1))
    best = 1
    for d in range(1, n + 1):
        if n % d == 0 and d <= cap:
            best = d
    return best


def _selection_matrices(h, w):
    """One-hot (H*W, Ho*Wo) matrices selecting the even/even and odd/odd grids.

    Out-of-range odd-grid sources (odd H or W) get an all-zero column, which
    reproduces ConstantPad2d((0,1,0,1), 0) followed by [:, :, 1:, 1:].
    """
    ho, wo = (h + 1) // 2, (w + 1) // 2
    mats = []
    for parity in (0, 1):
        s = np.zeros((h * w, ho * wo), dtype=np.float32)
        for i in range(ho):
            src_h = 2 * i + parity
            if src_h >= h:
                continue
            for j in range(wo):
                src_w = 2 * j + parity
                if src_w >= w:
                    continue
                s[src_h * w + src_w, i * wo + j] = 1.0
        mats.append(jnp.asarray(s, dtype=jnp.bfloat16))
    return mats


# ---------------------------------------------------------------------------
# In-kernel building blocks
# ---------------------------------------------------------------------------
def _loop_samples(nb, body, carry):
    """Per-block sample loop: static unroll when short, fori_loop when long.

    `body(j, carry) -> carry` may store to refs (side effects are fine in both
    forms).  Bounding the unroll keeps compile time and live ranges in check
    for large batches while the HBM block stays ~1 MiB.
    """
    if nb <= _MAX_UNROLL:
        for j in range(nb):
            carry = body(j, carry)
        return carry
    return lax.fori_loop(0, nb, body, carry)


def _bf16_split3(x_f32):
    """Split an f32 tensor into three bf16-exact pieces (x == p0 + p1 + p2)."""
    p0 = x_f32.astype(jnp.bfloat16)
    r1 = x_f32 - p0.astype(jnp.float32)
    p1 = r1.astype(jnp.bfloat16)
    r2 = r1 - p1.astype(jnp.float32)
    p2 = r2.astype(jnp.bfloat16)
    return p0, p1, p2


def _select_from_pieces(pieces, sel_bf16):
    """Gather the stride-2 pixel grid with a one-hot matmul on the idle MXU.

    Every output element is a sum of single bf16 * 1.0 products accumulated in
    f32, so the gather is bit-exact (to ~2^-27) regardless of how the MXU
    emulates f32.  Lane-dim strided loads are not reliably lowered by Mosaic,
    so a gather-matmul is the robust way to subsample the minormost axis.
    """
    out = jnp.dot(pieces[0], sel_bf16, preferred_element_type=jnp.float32)
    for p in pieces[1:]:
        out = out + jnp.dot(p, sel_bf16, preferred_element_type=jnp.float32)
    return out


def _channel_mac(w, x):
    """(C_out, C_in) x (C_in, P) -> (C_out, P) as an unrolled VPU broadcast-FMA.

    C_in is tiny (4 here), so the data path stays off the MXU (exact f32) and
    pixels stay on the lane axis throughout.
    """
    c_in = x.shape[0]
    acc = w[:, 0:1] * x[0:1, :]
    for ci in range(1, c_in):
        acc = acc + w[:, ci:ci + 1] * x[ci:ci + 1, :]
    return acc


# ---------------------------------------------------------------------------
# Pallas kernels — stride == 2 path
# ---------------------------------------------------------------------------
def _fr_s2_phase1_kernel(x_ref, s0_ref, s1_ref, w0_ref, w1_ref, y_ref, stats_ref):
    # x_ref: (nb, C_in, H*W); s*: (H*W, Ho*Wo) one-hot bf16; w0/w1: (C0/C1, C_in)
    # y_ref: (nb, C_out, Ho*Wo); stats_ref: (1, C_out, 2) per-block [sum, sum_sq]
    nb = x_ref.shape[0]
    c0 = w0_ref.shape[0]
    c1 = w1_ref.shape[0]
    c_out = c0 + c1

    s0 = s0_ref[...]
    s1 = s1_ref[...]
    w0 = w0_ref[...]
    w1 = w1_ref[...]

    def body(j, carry):
        acc_s0, acc_q0, acc_s1, acc_q1 = carry
        xr = jnp.maximum(x_ref[j], 0.0)            # ReLU, (C_in, H*W)
        pieces = _bf16_split3(xr)                  # split once, reuse for both grids
        t0 = _select_from_pieces(pieces, s0)       # (C_in, Ho*Wo) even/even grid
        t1 = _select_from_pieces(pieces, s1)       # (C_in, Ho*Wo) odd/odd (padded) grid
        y0 = _channel_mac(w0, t0)                  # (C0, Ho*Wo)
        y1 = _channel_mac(w1, t1)                  # (C1, Ho*Wo)
        # Write both branches straight into their channel slabs (no concat);
        # stores are lane-dense over Ho*Wo pixels instead of 8 channels.
        y_ref[j, 0:c0, :] = y0.astype(y_ref.dtype)
        y_ref[j, c0:c_out, :] = y1.astype(y_ref.dtype)
        # Partial BatchNorm statistics for this block (cross-lane sums -> XLU).
        return (acc_s0 + jnp.sum(y0, axis=1, keepdims=True),
                acc_q0 + jnp.sum(y0 * y0, axis=1, keepdims=True),
                acc_s1 + jnp.sum(y1, axis=1, keepdims=True),
                acc_q1 + jnp.sum(y1 * y1, axis=1, keepdims=True))

    init = (jnp.zeros((c0, 1), jnp.float32), jnp.zeros((c0, 1), jnp.float32),
            jnp.zeros((c1, 1), jnp.float32), jnp.zeros((c1, 1), jnp.float32))
    acc_s0, acc_q0, acc_s1, acc_q1 = _loop_samples(nb, body, init)

    stats_ref[0, 0:c0, 0:1] = acc_s0
    stats_ref[0, c0:c_out, 0:1] = acc_s1
    stats_ref[0, 0:c0, 1:2] = acc_q0
    stats_ref[0, c0:c_out, 1:2] = acc_q1


def _bn_apply_kernel(y_ref, scale_ref, shift_ref, o_ref):
    # Folded BatchNorm: a single fused multiply-add per element.
    # The y buffer is aliased to the output (input_output_aliases) -> in place.
    o_ref[...] = (y_ref[...] * scale_ref[...] + shift_ref[...]).astype(o_ref.dtype)


# ---------------------------------------------------------------------------
# Pallas kernels — stride == 1 path (y never written to HBM)
# ---------------------------------------------------------------------------
def _conv1x1_stats_kernel(x_ref, w_ref, stats_ref):
    # Pass A: stream x, emit per-block per-channel [sum, sum_sq] of y = W @ x.
    nb = x_ref.shape[0]
    c_out = w_ref.shape[0]
    w = w_ref[...]

    def body(j, carry):
        acc_s, acc_q = carry
        y = _channel_mac(w, x_ref[j])              # (C_out, H*W), exact f32 on VPU
        return (acc_s + jnp.sum(y, axis=1, keepdims=True),
                acc_q + jnp.sum(y * y, axis=1, keepdims=True))

    acc_s, acc_q = _loop_samples(
        nb, body,
        (jnp.zeros((c_out, 1), jnp.float32), jnp.zeros((c_out, 1), jnp.float32)))
    stats_ref[0, :, 0:1] = acc_s
    stats_ref[0, :, 1:2] = acc_q


def _conv1x1_bn_kernel(x_ref, w_ref, scale_ref, shift_ref, o_ref):
    # Pass B: re-read x, recompute the (tiny) 1x1 conv, apply folded BN, write out.
    nb = x_ref.shape[0]
    w = w_ref[...]
    scale = scale_ref[0]                           # (C_out, 1)
    shift = shift_ref[0]                           # (C_out, 1)

    def body(j, carry):
        y = _channel_mac(w, x_ref[j])              # (C_out, H*W)
        o_ref[j, :, :] = (y * scale + shift).astype(o_ref.dtype)
        return carry

    _loop_samples(nb, body, 0)


# ---------------------------------------------------------------------------
# Wrappers (pure layout plumbing: only free reshapes, no transposes/pads)
# ---------------------------------------------------------------------------
def _bn_scale_shift(stats, count, gamma, beta):
    sums = jnp.sum(stats, axis=0)                                   # (C_out, 2)
    mean = sums[:, 0] / count
    var = jnp.maximum(sums[:, 1] / count - mean * mean, 0.0)        # biased variance
    scale = gamma.astype(jnp.float32) * lax.rsqrt(var + BN_EPS)
    shift = beta.astype(jnp.float32) - mean * scale
    return scale, shift


def _bn_apply_inplace(y, scale, shift):
    n, c_out, p = y.shape
    nb = _block_samples(n, c_out * p * 4)
    return pl.pallas_call(
        _bn_apply_kernel,
        out_shape=jax.ShapeDtypeStruct((n, c_out, p), jnp.float32),
        grid=(n // nb,),
        in_specs=[
            pl.BlockSpec((nb, c_out, p), lambda i: (i, 0, 0)),
            pl.BlockSpec((1, c_out, 1), lambda i: (0, 0, 0)),
            pl.BlockSpec((1, c_out, 1), lambda i: (0, 0, 0)),
        ],
        out_specs=pl.BlockSpec((nb, c_out, p), lambda i: (i, 0, 0)),
        # Reuse y's HBM buffer for the normalized output (elementwise, same block
        # read then written each step -> safe under the pipeline).
        input_output_aliases={0: 0},
        compiler_params=pltpu.CompilerParams(
            dimension_semantics=("parallel",),
            vmem_limit_bytes=_VMEM_LIMIT,
        ),
    )(y, scale.reshape(1, c_out, 1), shift.reshape(1, c_out, 1))


@jax.jit
def factorized_reduce_stride2(x_nchw, w0, w1, gamma, beta):
    """x: (N, C_in, H, W); w0: (C0, C_in, 1, 1); w1: (C1, C_in, 1, 1)."""
    n, c_in, h, w = x_nchw.shape
    c0, c1 = w0.shape[0], w1.shape[0]
    c_out = c0 + c1
    ho, wo = (h + 1) // 2, (w + 1) // 2
    hw, p = h * w, ho * wo

    x3 = x_nchw.reshape(n, c_in, hw)                 # free reshape, NCHW order kept
    s0, s1 = _selection_matrices(h, w)               # constant one-hot gathers
    w0m = w0.reshape(c0, c_in).astype(jnp.float32)
    w1m = w1.reshape(c1, c_in).astype(jnp.float32)

    nb = _block_samples(n, c_in * hw * 4)
    nblk = n // nb

    y, stats = pl.pallas_call(
        _fr_s2_phase1_kernel,
        out_shape=(
            jax.ShapeDtypeStruct((n, c_out, p), jnp.float32),
            jax.ShapeDtypeStruct((nblk, c_out, 2), jnp.float32),
        ),
        grid=(nblk,),
        in_specs=[
            pl.BlockSpec((nb, c_in, hw), lambda i: (i, 0, 0)),
            pl.BlockSpec((hw, p), lambda i: (0, 0)),
            pl.BlockSpec((hw, p), lambda i: (0, 0)),
            pl.BlockSpec((c0, c_in), lambda i: (0, 0)),
            pl.BlockSpec((c1, c_in), lambda i: (0, 0)),
        ],
        out_specs=(
            pl.BlockSpec((nb, c_out, p), lambda i: (i, 0, 0)),
            pl.BlockSpec((1, c_out, 2), lambda i: (i, 0, 0)),
        ),
        compiler_params=pltpu.CompilerParams(
            dimension_semantics=("parallel",),
            vmem_limit_bytes=_VMEM_LIMIT,
        ),
    )(x3, s0, s1, w0m, w1m)

    scale, shift = _bn_scale_shift(stats, float(n * p), gamma, beta)
    out = _bn_apply_inplace(y, scale, shift)
    return out.reshape(n, c_out, ho, wo)             # free reshape back to NCHW


@jax.jit
def factorized_reduce_stride1(x_nchw, w, gamma, beta):
    """x: (N, C_in, H, W); w: (C_out, C_in, 1, 1)."""
    n, c_in, h, width = x_nchw.shape
    c_out = w.shape[0]
    hw = h * width

    x3 = x_nchw.reshape(n, c_in, hw)
    wm = w.reshape(c_out, c_in).astype(jnp.float32)

    nb = _block_samples(n, c_in * hw * 4)
    nblk = n // nb
    params = pltpu.CompilerParams(
        dimension_semantics=("parallel",),
        vmem_limit_bytes=_VMEM_LIMIT,
    )

    # Pass A: statistics only — y never touches HBM.
    stats = pl.pallas_call(
        _conv1x1_stats_kernel,
        out_shape=jax.ShapeDtypeStruct((nblk, c_out, 2), jnp.float32),
        grid=(nblk,),
        in_specs=[
            pl.BlockSpec((nb, c_in, hw), lambda i: (i, 0, 0)),
            pl.BlockSpec((c_out, c_in), lambda i: (0, 0)),
        ],
        out_specs=pl.BlockSpec((1, c_out, 2), lambda i: (i, 0, 0)),
        compiler_params=params,
    )(x3, wm)

    scale, shift = _bn_scale_shift(stats, float(n * hw), gamma, beta)

    # Pass B: fused conv + folded BatchNorm, single lane-dense output write.
    out = pl.pallas_call(
        _conv1x1_bn_kernel,
        out_shape=jax.ShapeDtypeStruct((n, c_out, hw), jnp.float32),
        grid=(nblk,),
        in_specs=[
            pl.BlockSpec((nb, c_in, hw), lambda i: (i, 0, 0)),
            pl.BlockSpec((c_out, c_in), lambda i: (0, 0)),
            pl.BlockSpec((1, c_out, 1), lambda i: (0, 0, 0)),
            pl.BlockSpec((1, c_out, 1), lambda i: (0, 0, 0)),
        ],
        out_specs=pl.BlockSpec((nb, c_out, hw), lambda i: (i, 0, 0)),
        compiler_params=params,
    )(x3, wm, scale.reshape(1, c_out, 1), shift.reshape(1, c_out, 1))

    return out.reshape(n, c_out, h, width)


# ---------------------------------------------------------------------------
# Pure-JAX references (exact f32 elementwise math; no conv/dot precision issues)
# ---------------------------------------------------------------------------
def _ref_conv1x1(x_nchw, w2d):
    c_out, c_in = w2d.shape
    outs = []
    for co in range(c_out):
        acc = w2d[co, 0] * x_nchw[:, 0]
        for ci in range(1, c_in):
            acc = acc + w2d[co, ci] * x_nchw[:, ci]
        outs.append(acc)
    return jnp.stack(outs, axis=1)


def _ref_bn(y, gamma, beta):
    mean = jnp.mean(y, axis=(0, 2, 3), keepdims=True)
    var = jnp.mean((y - mean) ** 2, axis=(0, 2, 3), keepdims=True)
    g = gamma.reshape(1, -1, 1, 1)
    b = beta.reshape(1, -1, 1, 1)
    return g * (y - mean) / jnp.sqrt(var + BN_EPS) + b


def ref_stride2(x, w0, w1, gamma, beta):
    n, c_in, h, w = x.shape
    xr = jnp.maximum(x, 0.0)
    xe = xr[:, :, 0::2, 0::2]
    xp = jnp.pad(xr, ((0, 0), (0, 0), (0, 1), (0, 1)))[:, :, 1:, 1:]
    xo = xp[:, :, 0::2, 0::2]
    y0 = _ref_conv1x1(xe, w0.reshape(w0.shape[0], c_in))
    y1 = _ref_conv1x1(xo, w1.reshape(w1.shape[0], c_in))
    return _ref_bn(jnp.concatenate([y0, y1], axis=1), gamma, beta)


def ref_stride1(x, w, gamma, beta):
    n, c_in, h, width = x.shape
    y = _ref_conv1x1(x, w.reshape(w.shape[0], c_in))
    return _ref_bn(y, gamma, beta)


# ---------------------------------------------------------------------------
if __name__ == "__main__":
    N, C_in, C_out, H, W = 2, 4, 8, 16, 16
    C0, C1 = C_out // 2, C_out - C_out // 2

    key = jax.random.PRNGKey(0)
    kx, k0, k1, ks, kg, kb = jax.random.split(key, 6)

    x = jax.random.normal(kx, (N, C_in, H, W), dtype=jnp.float32)
    w0 = 0.1 * jax.random.normal(k0, (C0, C_in, 1, 1), dtype=jnp.float32)
    w1 = 0.1 * jax.random.normal(k1, (C1, C_in, 1, 1), dtype=jnp.float32)
    w_s1 = 0.1 * jax.random.normal(ks, (C_out, C_in, 1, 1), dtype=jnp.float32)
    gamma = 1.0 + 0.1 * jax.random.normal(kg, (C_out,), dtype=jnp.float32)
    beta = 0.1 * jax.random.normal(kb, (C_out,), dtype=jnp.float32)

    # stride == 2 path (the FactorizedReduce hot path)
    out2 = jax.block_until_ready(factorized_reduce_stride2(x, w0, w1, gamma, beta))
    ref2 = jax.block_until_ready(ref_stride2(x, w0, w1, gamma, beta))
    assert out2.shape == (N, C_out, H // 2, W // 2), out2.shape
    np.testing.assert_allclose(np.asarray(out2), np.asarray(ref2), rtol=1e-4, atol=1e-5)

    # stride == 1 path
    out1 = jax.block_until_ready(factorized_reduce_stride1(x, w_s1, gamma, beta))
    ref1 = jax.block_until_ready(ref_stride1(x, w_s1, gamma, beta))
    assert out1.shape == (N, C_out, H, W), out1.shape
    np.testing.assert_allclose(np.asarray(out1), np.asarray(ref1), rtol=1e-4, atol=1e-5)

    print("KERNEL_OK")
</pallas_src>

<mosaic_0001>
module attributes {stable_mosaic.version = 11 : i64} {
  func.func @_fr_s2_phase1_kernel(%arg0: i32, %arg1: memref<2x4x256xf32, #tpu.memory_space<vmem>>, %arg2: memref<256x64xbf16, #tpu.memory_space<vmem>>, %arg3: memref<256x64xbf16, #tpu.memory_space<vmem>>, %arg4: memref<4x4xf32, #tpu.memory_space<vmem>>, %arg5: memref<4x4xf32, #tpu.memory_space<vmem>>, %arg6: memref<2x8x64xf32, #tpu.memory_space<vmem>>, %arg7: memref<1x8x2xf32, #tpu.memory_space<vmem>>) attributes {dimension_semantics = [#tpu.dimension_semantics<parallel>], iteration_bounds = array<i64: 1>, scalar_prefetch = 0 : i64, scratch_operands = 0 : i64, tpu.core_type = #tpu.core_type<tc>, window_params = [{transform_indices = @transform_0, window_bounds = array<i64: 2, 4, 256>}, {pipeline_mode = #tpu.pipeline_mode<synchronous>, transform_indices = @transform_1, window_bounds = array<i64: 256, 64>}, {pipeline_mode = #tpu.pipeline_mode<synchronous>, transform_indices = @transform_2, window_bounds = array<i64: 256, 64>}, {pipeline_mode = #tpu.pipeline_mode<synchronous>, transform_indices = @transform_3, window_bounds = array<i64: 4, 4>}, {pipeline_mode = #tpu.pipeline_mode<synchronous>, transform_indices = @transform_4, window_bounds = array<i64: 4, 4>}, {transform_indices = @transform_5, window_bounds = array<i64: 2, 8, 64>}, {transform_indices = @transform_6, window_bounds = array<i64: 1, 8, 2>}]} {
    %c0 = arith.constant 0 : index
    %c0_0 = arith.constant 0 : index
    %0 = vector.load %arg2[%c0, %c0_0] : memref<256x64xbf16, #tpu.memory_space<vmem>>, vector<256x64xbf16>
    %c0_1 = arith.constant 0 : index
    %c0_2 = arith.constant 0 : index
    %1 = vector.load %arg3[%c0_1, %c0_2] : memref<256x64xbf16, #tpu.memory_space<vmem>>, vector<256x64xbf16>
    %c0_3 = arith.constant 0 : index
    %c0_4 = arith.constant 0 : index
    %2 = vector.load %arg4[%c0_3, %c0_4] : memref<4x4xf32, #tpu.memory_space<vmem>>, vector<4x4xf32>
    %c0_5 = arith.constant 0 : index
    %c0_6 = arith.constant 0 : index
    %3 = vector.load %arg5[%c0_5, %c0_6] : memref<4x4xf32, #tpu.memory_space<vmem>>, vector<4x4xf32>
    %cst = arith.constant 0.000000e+00 : f32
    %4 = vector.broadcast %cst : f32 to vector<4x1xf32>
    %cst_7 = arith.constant 0.000000e+00 : f32
    %5 = vector.broadcast %cst_7 : f32 to vector<4x1xf32>
    %cst_8 = arith.constant 0.000000e+00 : f32
    %6 = vector.broadcast %cst_8 : f32 to vector<4x1xf32>
    %cst_9 = arith.constant 0.000000e+00 : f32
    %7 = vector.broadcast %cst_9 : f32 to vector<4x1xf32>
    %c0_10 = arith.constant 0 : index
    %c0_11 = arith.constant 0 : index
    %c0_12 = arith.constant 0 : index
    %8 = vector.load %arg1[%c0_10, %c0_11, %c0_12] : memref<2x4x256xf32, #tpu.memory_space<vmem>>, vector<1x4x256xf32>
    %9 = vector.shape_cast %8 : vector<1x4x256xf32> to vector<4x256xf32>
    %cst_13 = arith.constant 0.000000e+00 : f32
    %10 = vector.broadcast %cst_13 : f32 to vector<4x256xf32>
    %11 = arith.maximumf %9, %10 : vector<4x256xf32>
    %12 = arith.truncf %11 : vector<4x256xf32> to vector<4x256xbf16>
    %13 = arith.extf %12 : vector<4x256xbf16> to vector<4x256xf32>
    %14 = arith.subf %11, %13 : vector<4x256xf32>
    %15 = arith.truncf %14 : vector<4x256xf32> to vector<4x256xbf16>
    %16 = arith.extf %15 : vector<4x256xbf16> to vector<4x256xf32>
    %17 = arith.subf %14, %16 : vector<4x256xf32>
    %18 = arith.truncf %17 : vector<4x256xf32> to vector<4x256xbf16>
    %cst_14 = arith.constant dense<0.000000e+00> : vector<4x64xf32>
    %19 = tpu.matmul %12, %0, %cst_14 {dimension_numbers = #tpu.dot_dimension_numbers<[1], [0], [0], [1], [0, 0, 1, 1], [], []>} : vector<4x256xbf16>, vector<256x64xbf16>, vector<4x64xf32> -> vector<4x64xf32>
    %cst_15 = arith.constant dense<0.000000e+00> : vector<4x64xf32>
    %20 = tpu.matmul %15, %0, %cst_15 {dimension_numbers = #tpu.dot_dimension_numbers<[1], [0], [0], [1], [0, 0, 1, 1], [], []>} : vector<4x256xbf16>, vector<256x64xbf16>, vector<4x64xf32> -> vector<4x64xf32>
    %21 = arith.addf %19, %20 : vector<4x64xf32>
    %cst_16 = arith.constant dense<0.000000e+00> : vector<4x64xf32>
    %22 = tpu.matmul %18, %0, %cst_16 {dimension_numbers = #tpu.dot_dimension_numbers<[1], [0], [0], [1], [0, 0, 1, 1], [], []>} : vector<4x256xbf16>, vector<256x64xbf16>, vector<4x64xf32> -> vector<4x64xf32>
    %23 = arith.addf %21, %22 : vector<4x64xf32>
    %cst_17 = arith.constant dense<0.000000e+00> : vector<4x64xf32>
    %24 = tpu.matmul %12, %1, %cst_17 {dimension_numbers = #tpu.dot_dimension_numbers<[1], [0], [0], [1], [0, 0, 1, 1], [], []>} : vector<4x256xbf16>, vector<256x64xbf16>, vector<4x64xf32> -> vector<4x64xf32>
    %cst_18 = arith.constant dense<0.000000e+00> : vector<4x64xf32>
    %25 = tpu.matmul %15, %1, %cst_18 {dimension_numbers = #tpu.dot_dimension_numbers<[1], [0], [0], [1], [0, 0, 1, 1], [], []>} : vector<4x256xbf16>, vector<256x64xbf16>, vector<4x64xf32> -> vector<4x64xf32>
    %26 = arith.addf %24, %25 : vector<4x64xf32>
    %cst_19 = arith.constant dense<0.000000e+00> : vector<4x64xf32>
    %27 = tpu.matmul %18, %1, %cst_19 {dimension_numbers = #tpu.dot_dimension_numbers<[1], [0], [0], [1], [0, 0, 1, 1], [], []>} : vector<4x256xbf16>, vector<256x64xbf16>, vector<4x64xf32> -> vector<4x64xf32>
    %28 = arith.addf %26, %27 : vector<4x64xf32>
    %29 = vector.extract_strided_slice %2 {offsets = [0, 0], sizes = [4, 1], strides = [1, 1]} : vector<4x4xf32> to vector<4x1xf32>
    %30 = vector.extract_strided_slice %23 {offsets = [0, 0], sizes = [1, 64], strides = [1, 1]} : vector<4x64xf32> to vector<1x64xf32>
    %31 = vector.broadcast %29 : vector<4x1xf32> to vector<4x64xf32>
    %32 = vector.broadcast %30 : vector<1x64xf32> to vector<4x64xf32>
    %33 = arith.mulf %31, %32 : vector<4x64xf32>
    %34 = vector.extract_strided_slice %2 {offsets = [0, 1], sizes = [4, 1], strides = [1, 1]} : vector<4x4xf32> to vector<4x1xf32>
    %35 = vector.extract_strided_slice %23 {offsets = [1, 0], sizes = [1, 64], strides = [1, 1]} : vector<4x64xf32> to vector<1x64xf32>
    %36 = vector.broadcast %34 : vector<4x1xf32> to vector<4x64xf32>
    %37 = vector.broadcast %35 : vector<1x64xf32> to vector<4x64xf32>
    %38 = arith.mulf %36, %37 : vector<4x64xf32>
    %39 = arith.addf %33, %38 : vector<4x64xf32>
    %40 = vector.extract_strided_slice %2 {offsets = [0, 2], sizes = [4, 1], strides = [1, 1]} : vector<4x4xf32> to vector<4x1xf32>
    %41 = vector.extract_strided_slice %23 {offsets = [2, 0], sizes = [1, 64], strides = [1, 1]} : vector<4x64xf32> to vector<1x64xf32>
    %42 = vector.broadcast %40 : vector<4x1xf32> to vector<4x64xf32>
    %43 = vector.broadcast %41 : vector<1x64xf32> to vector<4x64xf32>
    %44 = arith.mulf %42, %43 : vector<4x64xf32>
    %45 = arith.addf %39, %44 : vector<4x64xf32>
    %46 = vector.extract_strided_slice %2 {offsets = [0, 3], sizes = [4, 1], strides = [1, 1]} : vector<4x4xf32> to vector<4x1xf32>
    %47 = vector.extract_strided_slice %23 {offsets = [3, 0], sizes = [1, 64], strides = [1, 1]} : vector<4x64xf32> to vector<1x64xf32>
    %48 = vector.broadcast %46 : vector<4x1xf32> to vector<4x64xf32>
    %49 = vector.broadcast %47 : vector<1x64xf32> to vector<4x64xf32>
    %50 = arith.mulf %48, %49 : vector<4x64xf32>
    %51 = arith.addf %45, %50 : vector<4x64xf32>
    %52 = vector.extract_strided_slice %3 {offsets = [0, 0], sizes = [4, 1], strides = [1, 1]} : vector<4x4xf32> to vector<4x1xf32>
    %53 = vector.extract_strided_slice %28 {offsets = [0, 0], sizes = [1, 64], strides = [1, 1]} : vector<4x64xf32> to vector<1x64xf32>
    %54 = vector.broadcast %52 : vector<4x1xf32> to vector<4x64xf32>
    %55 = vector.broadcast %53 : vector<1x64xf32> to vector<4x64xf32>
    %56 = arith.mulf %54, %55 : vector<4x64xf32>
    %57 = vector.extract_strided_slice %3 {offsets = [0, 1], sizes = [4, 1], strides = [1, 1]} : vector<4x4xf32> to vector<4x1xf32>
    %58 = vector.extract_strided_slice %28 {offsets = [1, 0], sizes = [1, 64], strides = [1, 1]} : vector<4x64xf32> to vector<1x64xf32>
    %59 = vector.broadcast %57 : vector<4x1xf32> to vector<4x64xf32>
    %60 = vector.broadcast %58 : vector<1x64xf32> to vector<4x64xf32>
    %61 = arith.mulf %59, %60 : vector<4x64xf32>
    %62 = arith.addf %56, %61 : vector<4x64xf32>
    %63 = vector.extract_strided_slice %3 {offsets = [0, 2], sizes = [4, 1], strides = [1, 1]} : vector<4x4xf32> to vector<4x1xf32>
    %64 = vector.extract_strided_slice %28 {offsets = [2, 0], sizes = [1, 64], strides = [1, 1]} : vector<4x64xf32> to vector<1x64xf32>
    %65 = vector.broadcast %63 : vector<4x1xf32> to vector<4x64xf32>
    %66 = vector.broadcast %64 : vector<1x64xf32> to vector<4x64xf32>
    %67 = arith.mulf %65, %66 : vector<4x64xf32>
    %68 = arith.addf %62, %67 : vector<4x64xf32>
    %69 = vector.extract_strided_slice %3 {offsets = [0, 3], sizes = [4, 1], strides = [1, 1]} : vector<4x4xf32> to vector<4x1xf32>
    %70 = vector.extract_strided_slice %28 {offsets = [3, 0], sizes = [1, 64], strides = [1, 1]} : vector<4x64xf32> to vector<1x64xf32>
    %71 = vector.broadcast %69 : vector<4x1xf32> to vector<4x64xf32>
    %72 = vector.broadcast %70 : vector<1x64xf32> to vector<4x64xf32>
    %73 = arith.mulf %71, %72 : vector<4x64xf32>
    %74 = arith.addf %68, %73 : vector<4x64xf32>
    %c0_20 = arith.constant 0 : index
    %c0_21 = arith.constant 0 : index
    %c0_22 = arith.constant 0 : index
    %75 = vector.load %arg6[%c0_20, %c0_21, %c0_22] : memref<2x8x64xf32, #tpu.memory_space<vmem>>, vector<1x4x64xf32>
    %76 = vector.shape_cast %75 : vector<1x4x64xf32> to vector<4x64xf32>
    %77 = vector.shape_cast %51 : vector<4x64xf32> to vector<1x4x64xf32>
    tpu.vector_store %arg6[%c0_20, %c0_21, %c0_22], %77 {strides = array<i32>} : memref<2x8x64xf32, #tpu.memory_space<vmem>>, vector<1x4x64xf32>,
    %c0_23 = arith.constant 0 : index
    %c4 = arith.constant 4 : index
    %c0_24 = arith.constant 0 : index
    %78 = vector.load %arg6[%c0_23, %c4, %c0_24] : memref<2x8x64xf32, #tpu.memory_space<vmem>>, vector<1x4x64xf32>
    %79 = vector.shape_cast %78 : vector<1x4x64xf32> to vector<4x64xf32>
    %80 = vector.shape_cast %74 : vector<4x64xf32> to vector<1x4x64xf32>
    tpu.vector_store %arg6[%c0_23, %c4, %c0_24], %80 {strides = array<i32>} : memref<2x8x64xf32, #tpu.memory_space<vmem>>, vector<1x4x64xf32>,
    %cst_25 = arith.constant dense<0.000000e+00> : vector<4xf32>
    %81 = vector.multi_reduction <add>, %51, %cst_25 [1] : vector<4x64xf32> to vector<4xf32>
    %82 = vector.shape_cast %81 : vector<4xf32> to vector<4x1xf32>
    %83 = arith.addf %4, %82 : vector<4x1xf32>
    %84 = arith.mulf %51, %51 : vector<4x64xf32>
    %cst_26 = arith.constant dense<0.000000e+00> : vector<4xf32>
    %85 = vector.multi_reduction <add>, %84, %cst_26 [1] : vector<4x64xf32> to vector<4xf32>
    %86 = vector.shape_cast %85 : vector<4xf32> to vector<4x1xf32>
    %87 = arith.addf %5, %86 : vector<4x1xf32>
    %cst_27 = arith.constant dense<0.000000e+00> : vector<4xf32>
    %88 = vector.multi_reduction <add>, %74, %cst_27 [1] : vector<4x64xf32> to vector<4xf32>
    %89 = vector.shape_cast %88 : vector<4xf32> to vector<4x1xf32>
    %90 = arith.addf %6, %89 : vector<4x1xf32>
    %91 = arith.mulf %74, %74 : vector<4x64xf32>
    %cst_28 = arith.constant dense<0.000000e+00> : vector<4xf32>
    %92 = vector.multi_reduction <add>, %91, %cst_28 [1] : vector<4x64xf32> to vector<4xf32>
    %93 = vector.shape_cast %92 : vector<4xf32> to vector<4x1xf32>
    %94 = arith.addf %7, %93 : vector<4x1xf32>
    %c1 = arith.constant 1 : index
    %c0_29 = arith.constant 0 : index
    %c0_30 = arith.constant 0 : index
    %95 = vector.load %arg1[%c1, %c0_29, %c0_30] : memref<2x4x256xf32, #tpu.memory_space<vmem>>, vector<1x4x256xf32>
    %96 = vector.shape_cast %95 : vector<1x4x256xf32> to vector<4x256xf32>
    %cst_31 = arith.constant 0.000000e+00 : f32
    %97 = vector.broadcast %cst_31 : f32 to vector<4x256xf32>
    %98 = arith.maximumf %96, %97 : vector<4x256xf32>
    %99 = arith.truncf %98 : vector<4x256xf32> to vector<4x256xbf16>
    %100 = arith.extf %99 : vector<4x256xbf16> to vector<4x256xf32>
    %101 = arith.subf %98, %100 : vector<4x256xf32>
    %102 = arith.truncf %101 : vector<4x256xf32> to vector<4x256xbf16>
    %103 = arith.extf %102 : vector<4x256xbf16> to vector<4x256xf32>
    %104 = arith.subf %101, %103 : vector<4x256xf32>
    %105 = arith.truncf %104 : vector<4x256xf32> to vector<4x256xbf16>
    %cst_32 = arith.constant dense<0.000000e+00> : vector<4x64xf32>
    %106 = tpu.matmul %99, %0, %cst_32 {dimension_numbers = #tpu.dot_dimension_numbers<[1], [0], [0], [1], [0, 0, 1, 1], [], []>} : vector<4x256xbf16>, vector<256x64xbf16>, vector<4x64xf32> -> vector<4x64xf32>
    %cst_33 = arith.constant dense<0.000000e+00> : vector<4x64xf32>
    %107 = tpu.matmul %102, %0, %cst_33 {dimension_numbers = #tpu.dot_dimension_numbers<[1], [0], [0], [1], [0, 0, 1, 1], [], []>} : vector<4x256xbf16>, vector<256x64xbf16>, vector<4x64xf32> -> vector<4x64xf32>
    %108 = arith.addf %106, %107 : vector<4x64xf32>
    %cst_34 = arith.constant dense<0.000000e+00> : vector<4x64xf32>
    %109 = tpu.matmul %105, %0, %cst_34 {dimension_numbers = #tpu.dot_dimension_numbers<[1], [0], [0], [1], [0, 0, 1, 1], [], []>} : vector<4x256xbf16>, vector<256x64xbf16>, vector<4x64xf32> -> vector<4x64xf32>
    %110 = arith.addf %108, %109 : vector<4x64xf32>
    %cst_35 = arith.constant dense<0.000000e+00> : vector<4x64xf32>
    %111 = tpu.matmul %99, %1, %cst_35 {dimension_numbers = #tpu.dot_dimension_numbers<[1], [0], [0], [1], [0, 0, 1, 1], [], []>} : vector<4x256xbf16>, vector<256x64xbf16>, vector<4x64xf32> -> vector<4x64xf32>
    %cst_36 = arith.constant dense<0.000000e+00> : vector<4x64xf32>
    %112 = tpu.matmul %102, %1, %cst_36 {dimension_numbers = #tpu.dot_dimension_numbers<[1], [0], [0], [1], [0, 0, 1, 1], [], []>} : vector<4x256xbf16>, vector<256x64xbf16>, vector<4x64xf32> -> vector<4x64xf32>
    %113 = arith.addf %111, %112 : vector<4x64xf32>
    %cst_37 = arith.constant dense<0.000000e+00> : vector<4x64xf32>
    %114 = tpu.matmul %105, %1, %cst_37 {dimension_numbers = #tpu.dot_dimension_numbers<[1], [0], [0], [1], [0, 0, 1, 1], [], []>} : vector<4x256xbf16>, vector<256x64xbf16>, vector<4x64xf32> -> vector<4x64xf32>
    %115 = arith.addf %113, %114 : vector<4x64xf32>
    %116 = vector.extract_strided_slice %2 {offsets = [0, 0], sizes = [4, 1], strides = [1, 1]} : vector<4x4xf32> to vector<4x1xf32>
    %117 = vector.extract_strided_slice %110 {offsets = [0, 0], sizes = [1, 64], strides = [1, 1]} : vector<4x64xf32> to vector<1x64xf32>
    %118 = vector.broadcast %116 : vector<4x1xf32> to vector<4x64xf32>
    %119 = vector.broadcast %117 : vector<1x64xf32> to vector<4x64xf32>
    %120 = arith.mulf %118, %119 : vector<4x64xf32>
    %121 = vector.extract_strided_slice %2 {offsets = [0, 1], sizes = [4, 1], strides = [1, 1]} : vector<4x4xf32> to vector<4x1xf32>
    %122 = vector.extract_strided_slice %110 {offsets = [1, 0], sizes = [1, 64], strides = [1, 1]} : vector<4x64xf32> to vector<1x64xf32>
    %123 = vector.broadcast %121 : vector<4x1xf32> to vector<4x64xf32>
    %124 = vector.broadcast %122 : vector<1x64xf32> to vector<4x64xf32>
    %125 = arith.mulf %123, %124 : vector<4x64xf32>
    %126 = arith.addf %120, %125 : vector<4x64xf32>
    %127 = vector.extract_strided_slice %2 {offsets = [0, 2], sizes = [4, 1], strides = [1, 1]} : vector<4x4xf32> to vector<4x1xf32>
    %128 = vector.extract_strided_slice %110 {offsets = [2, 0], sizes = [1, 64], strides = [1, 1]} : vector<4x64xf32> to vector<1x64xf32>
    %129 = vector.broadcast %127 : vector<4x1xf32> to vector<4x64xf32>
    %130 = vector.broadcast %128 : vector<1x64xf32> to vector<4x64xf32>
    %131 = arith.mulf %129, %130 : vector<4x64xf32>
    %132 = arith.addf %126, %131 : vector<4x64xf32>
    %133 = vector.extract_strided_slice %2 {offsets = [0, 3], sizes = [4, 1], strides = [1, 1]} : vector<4x4xf32> to vector<4x1xf32>
    %134 = vector.extract_strided_slice %110 {offsets = [3, 0], sizes = [1, 64], strides = [1, 1]} : vector<4x64xf32> to vector<1x64xf32>
    %135 = vector.broadcast %133 : vector<4x1xf32> to vector<4x64xf32>
    %136 = vector.broadcast %134 : vector<1x64xf32> to vector<4x64xf32>
    %137 = arith.mulf %135, %136 : vector<4x64xf32>
    %138 = arith.addf %132, %137 : vector<4x64xf32>
    %139 = vector.extract_strided_slice %3 {offsets = [0, 0], sizes = [4, 1], strides = [1, 1]} : vector<4x4xf32> to vector<4x1xf32>
    %140 = vector.extract_strided_slice %115 {offsets = [0, 0], sizes = [1, 64], strides = [1, 1]} : vector<4x64xf32> to vector<1x64xf32>
    %141 = vector.broadcast %139 : vector<4x1xf32> to vector<4x64xf32>
    %142 = vector.broadcast %140 : vector<1x64xf32> to vector<4x64xf32>
    %143 = arith.mulf %141, %142 : vector<4x64xf32>
    %144 = vector.extract_strided_slice %3 {offsets = [0, 1], sizes = [4, 1], strides = [1, 1]} : vector<4x4xf32> to vector<4x1xf32>
    %145 = vector.extract_strided_slice %115 {offsets = [1, 0], sizes = [1, 64], strides = [1, 1]} : vector<4x64xf32> to vector<1x64xf32>
    %146 = vector.broadcast %144 : vector<4x1xf32> to vector<4x64xf32>
    %147 = vector.broadcast %145 : vector<1x64xf32> to vector<4x64xf32>
    %148 = arith.mulf %146, %147 : vector<4x64xf32>
    %149 = arith.addf %143, %148 : vector<4x64xf32>
    %150 = vector.extract_strided_slice %3 {offsets = [0, 2], sizes = [4, 1], strides = [1, 1]} : vector<4x4xf32> to vector<4x1xf32>
    %151 = vector.extract_strided_slice %115 {offsets = [2, 0], sizes = [1, 64], strides = [1, 1]} : vector<4x64xf32> to vector<1x64xf32>
    %152 = vector.broadcast %150 : vector<4x1xf32> to vector<4x64xf32>
    %153 = vector.broadcast %151 : vector<1x64xf32> to vector<4x64xf32>
    %154 = arith.mulf %152, %153 : vector<4x64xf32>
    %155 = arith.addf %149, %154 : vector<4x64xf32>
    %156 = vector.extract_strided_slice %3 {offsets = [0, 3], sizes = [4, 1], strides = [1, 1]} : vector<4x4xf32> to vector<4x1xf32>
    %157 = vector.extract_strided_slice %115 {offsets = [3, 0], sizes = [1, 64], strides = [1, 1]} : vector<4x64xf32> to vector<1x64xf32>
    %158 = vector.broadcast %156 : vector<4x1xf32> to vector<4x64xf32>
    %159 = vector.broadcast %157 : vector<1x64xf32> to vector<4x64xf32>
    %160 = arith.mulf %158, %159 : vector<4x64xf32>
    %161 = arith.addf %155, %160 : vector<4x64xf32>
    %c1_38 = arith.constant 1 : index
    %c0_39 = arith.constant 0 : index
    %c0_40 = arith.constant 0 : index
    %162 = vector.load %arg6[%c1_38, %c0_39, %c0_40] : memref<2x8x64xf32, #tpu.memory_space<vmem>>, vector<1x4x64xf32>
    %163 = vector.shape_cast %162 : vector<1x4x64xf32> to vector<4x64xf32>
    %164 = vector.shape_cast %138 : vector<4x64xf32> to vector<1x4x64xf32>
    tpu.vector_store %arg6[%c1_38, %c0_39, %c0_40], %164 {strides = array<i32>} : memref<2x8x64xf32, #tpu.memory_space<vmem>>, vector<1x4x64xf32>,
    %c1_41 = arith.constant 1 : index
    %c4_42 = arith.constant 4 : index
    %c0_43 = arith.constant 0 : index
    %165 = vector.load %arg6[%c1_41, %c4_42, %c0_43] : memref<2x8x64xf32, #tpu.memory_space<vmem>>, vector<1x4x64xf32>
    %166 = vector.shape_cast %165 : vector<1x4x64xf32> to vector<4x64xf32>
    %167 = vector.shape_cast %161 : vector<4x64xf32> to vector<1x4x64xf32>
    tpu.vector_store %arg6[%c1_41, %c4_42, %c0_43], %167 {strides = array<i32>} : memref<2x8x64xf32, #tpu.memory_space<vmem>>, vector<1x4x64xf32>,
    %cst_44 = arith.constant dense<0.000000e+00> : vector<4xf32>
    %168 = vector.multi_reduction <add>, %138, %cst_44 [1] : vector<4x64xf32> to vector<4xf32>
    %169 = vector.shape_cast %168 : vector<4xf32> to vector<4x1xf32>
    %170 = arith.addf %83, %169 : vector<4x1xf32>
    %171 = arith.mulf %138, %138 : vector<4x64xf32>
    %cst_45 = arith.constant dense<0.000000e+00> : vector<4xf32>
    %172 = vector.multi_reduction <add>, %171, %cst_45 [1] : vector<4x64xf32> to vector<4xf32>
    %173 = vector.shape_cast %172 : vector<4xf32> to vector<4x1xf32>
    %174 = arith.addf %87, %173 : vector<4x1xf32>
    %cst_46 = arith.constant dense<0.000000e+00> : vector<4xf32>
    %175 = vector.multi_reduction <add>, %161, %cst_46 [1] : vector<4x64xf32> to vector<4xf32>
    %176 = vector.shape_cast %175 : vector<4xf32> to vector<4x1xf32>
    %177 = arith.addf %90, %176 : vector<4x1xf32>
    %178 = arith.mulf %161, %161 : vector<4x64xf32>
    %cst_47 = arith.constant dense<0.000000e+00> : vector<4xf32>
    %179 = vector.multi_reduction <add>, %178, %cst_47 [1] : vector<4x64xf32> to vector<4xf32>
    %180 = vector.shape_cast %179 : vector<4xf32> to vector<4x1xf32>
    %181 = arith.addf %94, %180 : vector<4x1xf32>
    %c0_48 = arith.constant 0 : index
    %c0_49 = arith.constant 0 : index
    %c0_50 = arith.constant 0 : index
    %182 = vector.load %arg7[%c0_48, %c0_49, %c0_50] : memref<1x8x2xf32, #tpu.memory_space<vmem>>, vector<1x4x1xf32>
    %183 = vector.shape_cast %182 : vector<1x4x1xf32> to vector<4x1xf32>
    %184 = vector.shape_cast %170 : vector<4x1xf32> to vector<1x4x1xf32>
    tpu.vector_store %arg7[%c0_48, %c0_49, %c0_50], %184 {strides = array<i32>} : memref<1x8x2xf32, #tpu.memory_space<vmem>>, vector<1x4x1xf32>,
    %c0_51 = arith.constant 0 : index
    %c4_52 = arith.constant 4 : index
    %c0_53 = arith.constant 0 : index
    %185 = vector.load %arg7[%c0_51, %c4_52, %c0_53] : memref<1x8x2xf32, #tpu.memory_space<vmem>>, vector<1x4x1xf32>
    %186 = vector.shape_cast %185 : vector<1x4x1xf32> to vector<4x1xf32>
    %187 = vector.shape_cast %177 : vector<4x1xf32> to vector<1x4x1xf32>
    tpu.vector_store %arg7[%c0_51, %c4_52, %c0_53], %187 {strides = array<i32>} : memref<1x8x2xf32, #tpu.memory_space<vmem>>, vector<1x4x1xf32>,
    %c0_54 = arith.constant 0 : index
    %c0_55 = arith.constant 0 : index
    %c1_56 = arith.constant 1 : index
    %188 = vector.load %arg7[%c0_54, %c0_55, %c1_56] : memref<1x8x2xf32, #tpu.memory_space<vmem>>, vector<1x4x1xf32>
    %189 = vector.shape_cast %188 : vector<1x4x1xf32> to vector<4x1xf32>
    %190 = vector.shape_cast %174 : vector<4x1xf32> to vector<1x4x1xf32>
    tpu.vector_store %arg7[%c0_54, %c0_55, %c1_56], %190 {strides = array<i32>} : memref<1x8x2xf32, #tpu.memory_space<vmem>>, vector<1x4x1xf32>,
    %c0_57 = arith.constant 0 : index
    %c4_58 = arith.constant 4 : index
    %c1_59 = arith.constant 1 : index
    %191 = vector.load %arg7[%c0_57, %c4_58, %c1_59] : memref<1x8x2xf32, #tpu.memory_space<vmem>>, vector<1x4x1xf32>
    %192 = vector.shape_cast %191 : vector<1x4x1xf32> to vector<4x1xf32>
    %193 = vector.shape_cast %181 : vector<4x1xf32> to vector<1x4x1xf32>
    tpu.vector_store %arg7[%c0_57, %c4_58, %c1_59], %193 {strides = array<i32>} : memref<1x8x2xf32, #tpu.memory_space<vmem>>, vector<1x4x1xf32>,
    return
  }
  func.func @transform_0(%arg0: i32) -> (i32, i32, i32) {
    %c0_i32 = arith.constant 0 : i32
    %c0_i32_0 = arith.constant 0 : i32
    %c0_i32_1 = arith.constant 0 : i32
    return %arg0, %c0_i32, %c0_i32_0 : i32, i32, i32
  }
  func.func @transform_1(%arg0: i32) -> (i32, i32) {
    %c0_i32 = arith.constant 0 : i32
    %c0_i32_0 = arith.constant 0 : i32
    %c0_i32_1 = arith.constant 0 : i32
    return %c0_i32, %c0_i32_0 : i32, i32
  }
  func.func @transform_2(%arg0: i32) -> (i32, i32) {
    %c0_i32 = arith.constant 0 : i32
    %c0_i32_0 = arith.constant 0 : i32
    %c0_i32_1 = arith.constant 0 : i32
    return %c0_i32, %c0_i32_0 : i32, i32
  }
  func.func @transform_3(%arg0: i32) -> (i32, i32) {
    %c0_i32 = arith.constant 0 : i32
    %c0_i32_0 = arith.constant 0 : i32
    %c0_i32_1 = arith.constant 0 : i32
    return %c0_i32, %c0_i32_0 : i32, i32
  }
  func.func @transform_4(%arg0: i32) -> (i32, i32) {
    %c0_i32 = arith.constant 0 : i32
    %c0_i32_0 = arith.constant 0 : i32
    %c0_i32_1 = arith.constant 0 : i32
    return %c0_i32, %c0_i32_0 : i32, i32
  }
  func.func @transform_5(%arg0: i32) -> (i32, i32, i32) {
    %c0_i32 = arith.constant 0 : i32
    %c0_i32_0 = arith.constant 0 : i32
    %c0_i32_1 = arith.constant 0 : i32
    return %arg0, %c0_i32, %c0_i32_0 : i32, i32, i32
  }
  func.func @transform_6(%arg0: i32) -> (i32, i32, i32) {
    %c0_i32 = arith.constant 0 : i32
    %c0_i32_0 = arith.constant 0 : i32
    %c0_i32_1 = arith.constant 0 : i32
    return %arg0, %c0_i32, %c0_i32_0 : i32, i32, i32
  }
}

module attributes {stable_mosaic.version = 11 : i64} {
  func.func @_bn_apply_kernel(%arg0: i32, %arg1: memref<2x8x64xf32, #tpu.memory_space<vmem>>, %arg2: memref<1x8x1xf32, #tpu.memory_space<vmem>>, %arg3: memref<1x8x1xf32, #tpu.memory_space<vmem>>, %arg4: memref<2x8x64xf32, #tpu.memory_space<vmem>>) attributes {dimension_semantics = [#tpu.dimension_semantics<parallel>], iteration_bounds = array<i64: 1>, scalar_prefetch = 0 : i64, scratch_operands = 0 : i64, tpu.core_type = #tpu.core_type<tc>, window_params = [{transform_indices = @transform_0, window_bounds = array<i64: 2, 8, 64>}, {pipeline_mode = #tpu.pipeline_mode<synchronous>, transform_indices = @transform_1, window_bounds = array<i64: 1, 8, 1>}, {pipeline_mode = #tpu.pipeline_mode<synchronous>, transform_indices = @transform_2, window_bounds = array<i64: 1, 8, 1>}, {transform_indices = @transform_3, window_bounds = array<i64: 2, 8, 64>}]} {
    %c0 = arith.constant 0 : index
    %c0_0 = arith.constant 0 : index
    %c0_1 = arith.constant 0 : index
    %0 = vector.load %arg1[%c0, %c0_0, %c0_1] : memref<2x8x64xf32, #tpu.memory_space<vmem>>, vector<2x8x64xf32>
    %c0_2 = arith.constant 0 : index
    %c0_3 = arith.constant 0 : index
    %c0_4 = arith.constant 0 : index
    %1 = vector.load %arg2[%c0_2, %c0_3, %c0_4] : memref<1x8x1xf32, #tpu.memory_space<vmem>>, vector<1x8x1xf32>
    %2 = vector.broadcast %1 : vector<1x8x1xf32> to vector<2x8x64xf32>
    %3 = arith.mulf %0, %2 : vector<2x8x64xf32>
    %c0_5 = arith.constant 0 : index
    %c0_6 = arith.constant 0 : index
    %c0_7 = arith.constant 0 : index
    %4 = vector.load %arg3[%c0_5, %c0_6, %c0_7] : memref<1x8x1xf32, #tpu.memory_space<vmem>>, vector<1x8x1xf32>
    %5 = vector.broadcast %4 : vector<1x8x1xf32> to vector<2x8x64xf32>
    %6 = arith.addf %3, %5 : vector<2x8x64xf32>
    %c0_8 = arith.constant 0 : index
    %c0_9 = arith.constant 0 : index
    %c0_10 = arith.constant 0 : index
    %7 = vector.load %arg4[%c0_8, %c0_9, %c0_10] : memref<2x8x64xf32, #tpu.memory_space<vmem>>, vector<2x8x64xf32>
    tpu.vector_store %arg4[%c0_8, %c0_9, %c0_10], %6 {strides = array<i32>} : memref<2x8x64xf32, #tpu.memory_space<vmem>>, vector<2x8x64xf32>,
    return
  }
  func.func @transform_0(%arg0: i32) -> (i32, i32, i32) {
    %c0_i32 = arith.constant 0 : i32
    %c0_i32_0 = arith.constant 0 : i32
    %c0_i32_1 = arith.constant 0 : i32
    return %arg0, %c0_i32, %c0_i32_0 : i32, i32, i32
  }
  func.func @transform_1(%arg0: i32) -> (i32, i32, i32) {
    %c0_i32 = arith.constant 0 : i32
    %c0_i32_0 = arith.constant 0 : i32
    %c0_i32_1 = arith.constant 0 : i32
    %c0_i32_2 = arith.constant 0 : i32
    return %c0_i32, %c0_i32_0, %c0_i32_1 : i32, i32, i32
  }
  func.func @transform_2(%arg0: i32) -> (i32, i32, i32) {
    %c0_i32 = arith.constant 0 : i32
    %c0_i32_0 = arith.constant 0 : i32
    %c0_i32_1 = arith.constant 0 : i32
    %c0_i32_2 = arith.constant 0 : i32
    return %c0_i32, %c0_i32_0, %c0_i32_1 : i32, i32, i32
  }
  func.func @transform_3(%arg0: i32) -> (i32, i32, i32) {
    %c0_i32 = arith.constant 0 : i32
    %c0_i32_0 = arith.constant 0 : i32
    %c0_i32_1 = arith.constant 0 : i32
    return %arg0, %c0_i32, %c0_i32_0 : i32, i32, i32
  }
}

</mosaic_0001>

<bundles_post_ra>
// kernel: factorized_reduce_stride2.3
= control target key start
LH: loop header
LB: loop body
LE: loop exit
PB: predicated region body
PF: predicated region fallthrough
CT: control target
= control target key end

     0   :  { %v41_v0 = vmov 0   ;;  %vm32_vm0 = vcmask 523264   ;;  %s80_s1 = inlined_call_operand.vmem [shape: f32[1,8,1], index: 1, kind: input, shape index: {}]   ;;  %s81_s2 = inlined_call_operand.vmem [shape: f32[1,8,1], index: 2, kind: input, shape index: {}]   ;;  %s82_s0 = inlined_call_operand.vmem [shape: f32[2,8,64], index: 0, kind: input, shape index: {}, may-alias: {0,3}]   ;;  %s83_s3 = inlined_call_operand.vmem [shape: f32[2,8,64], index: 3, kind: output, shape index: {}, may-alias: {0,3}]  }
   0x1   :  { %40 = vset.pattern.permute.xlu0 %v41_v0  ;;  %v16_v1 = vld [vmem:[%s80_s1] sm:$0xff]  ;;  %v15_v5 = vld [vmem:[%s82_s0 + $0x8] sm:$0xff] }
   0x2   :  { %19 = vperm.xlu0 %40, %v16_v1   ;;  %v24_v2 = vld [vmem:[%s81_s2] sm:$0xff] }
   0x3   :  { %v14_v4 = vld [vmem:[%s82_s0] sm:$0xff] }
   0x6   :  { %27 = vperm.xlu0 %40, %v24_v2  }
  0x81   :  { %v20_v3 = vpop.permute.xlu0 %19 }
  0x82   :  { %v22_v6 = vmul.f32 %v20_v3, %v14_v4  ;;  %v23_v7 = vmul.f32 %v20_v3, %v15_v5 }
  0x85   :  { %v28_v8 = vpop.permute.xlu0 %27 }
  0x86   :  { %v30_v9 = vadd.f32 %v28_v8, %v22_v6  ;;  %v31_v10 = vadd.f32 %v28_v8, %v23_v7 }
  0x88   :  { %33 = vst.msk [vmem:[%s83_s3] sm:$0xff] %vm32_vm0, %v30_v9  ;;  %34 = vst.msk [vmem:[%s83_s3 + $0x8] sm:$0xff] %vm32_vm0, %v31_v10 }

// kernel: factorized_reduce_stride2.2
= control target key start
LH: loop header
LB: loop body
LE: loop exit
PB: predicated region body
PF: predicated region fallthrough
CT: control target
= control target key end

     0   :  { %12 = vsyncpa [#allocation3], 0  ;;  %s1395_s21 = smov [#allocation2]   ;;  %s1882_s0 = inlined_call_operand.vmem [shape: f32[2,4,256], index: 0, kind: input, shape index: {}]   ;;  %s1883_s1 = inlined_call_operand.hbm [shape: bf16[256,64], index: 1, kind: input, shape index: {}]   ;;  %s1884_s2 = inlined_call_operand.vmem [shape: bf16[256,64], index: 2, kind: input, shape index: {}]   ;;  %s1885_s3 = inlined_call_operand.vmem [shape: f32[4,4], index: 3, kind: input, shape index: {}]   ;;  %s1886_s4 = inlined_call_operand.vmem [shape: f32[4,4], index: 4, kind: input, shape index: {}]   ;;  %s1887_s5 = inlined_call_operand.vmem [shape: f32[2,8,64], index: 5, kind: output, shape index: {0}]   ;;  %s1888_s6 = inlined_call_operand.vmem [shape: f32[1,8,2], index: 6, kind: output, shape index: {1}]  }
   0x1   :  { %s20_s22 = sshll.u32 %s1395_s21, 4  ;;  %s1371_s25 = scalar_lea.hbm %s1883_s1, 2048  ;;  %s21_s22 = int_to_ptr.vmem [resolvable:$true] %s20_s22 }
   0x2   :  { %p1372_p0 = scmp.ne.s32.totalorder %s1883_s1, %s1371_s25  ;;  %p1375_p1 = scmp.lt.u32.totalorder %s1371_s25, %s1883_s1 }
   0x4   :  { %p1377_p2 = pnand %p1375_p1, %p1372_p0 }
   0x6   :  { %1380 = shalt.err (!%p1377_p2)
}
   0x7   :  { %s1381_s30 = scalar_lea.vmem %s21_s22, 2048  ;;  %p1386_p4 = scmp.lt.s32.totalorder %s21_s22, %s21_s22 }
   0x8   :  { %p1382_p3 = scmp.ne.s32.totalorder %s21_s22, %s1381_s30  ;;  %p1387_p5 = scmp.lt.s32.totalorder %s1381_s30, %s1381_s30 }
   0xa   :  { %p1388_p6 = por %p1387_p5, %p1386_p4 }
   0xc   :  { %p1389_p7 = pnand %p1388_p6, %p1382_p3 }
   0xe   :  { %1392 = shalt.err (!%p1389_p7)
}
   0xf   :  { %s1396_s7 = smov 64   ;;  %s1397_s8 = smov 4  }
  0x10   :  { %26 = dma.hbm_to_vmem [thread:$0]  %s1883_s1, 2048, %s21_s22, [#allocation3], %s1396_s7, %s1396_s7, %s1397_s8  }
  0x11   :  { %1393 = dma.done.wait [#allocation3], 2048  }
  0x12   :  { %1394 = vsyncadd [#allocation3], 4294965248  ;;  %v1449_v0 = vld [vmem:[#allocation2 + $0x40] sm:$0xff]   ;;  %v1455_v2 = vld [vmem:[#allocation2 + $0x48] sm:$0xff]   ;;  %v1398_v9 = vmov 0   ;;  %v1399_v40 = vmov 1  }
  0x13   :  { %v1451_v1 = vld [vmem:[#allocation2] sm:$0xff]   ;;  %1060 = vmatprep.subr.bf16.mxu0 %v1449_v0  ;;  %1082 = vmatprep.subr.bf16.mxu1 %v1449_v0  ;;  %v1459_v3 = vld [vmem:[#allocation2 + $0x8] sm:$0xff]   ;;  %v1463_v4 = vld [vmem:[#allocation2 + $0x50] sm:$0xff]   ;;  %v1400_v45 = vmov 2   ;;  %v1401_v50 = vmov 3   ;;  %vm648_vm0 = vcmask 519168  }
  0x14   :  { %1061 = vmatpush3.bf16.msra.mxu0 %v1451_v1  ;;  %1083 = vmatpush3.bf16.msra.mxu1 %v1451_v1  ;;  %v1467_v5 = vld [vmem:[#allocation2 + $0x10] sm:$0xff]   ;;  %v1471_v6 = vld [vmem:[#allocation2 + $0x58] sm:$0xff]   ;;  %v1479_v8 = vld [vmem:[#allocation2 + $0x60] sm:$0xff]   ;;  %vm1010_vm1 = vcmask 3072   ;;  %vm1013_vm2 = vcmask 11272  }
  0x15   :  { %1062 = vmatprep.subr.bf16.mxu0 %v1455_v2  ;;  %1084 = vmatprep.subr.bf16.mxu1 %v1455_v2  ;;  %v1475_v7 = vld [vmem:[#allocation2 + $0x18] sm:$0xff]   ;;  %v1481_v10 = vld [vmem:[#allocation2 + $0x20] sm:$0xff]   ;;  %v1485_v11 = vld [vmem:[#allocation2 + $0x68] sm:$0xff]  }
  0x16   :  { %1333 = vset.pattern.permute.xlu1 %v1398_v9  ;;  %1331 = vset.pattern.permute.xlu0 %v1398_v9  ;;  %v103_v12 = vld [vmem:[%s1882_s0] sm:$0xff]  ;;  %v1494_v14 = vld [vmem:[#allocation2 + $0x28] sm:$0xff]   ;;  %v1500_v17 = vld [vmem:[#allocation2 + $0x70] sm:$0xff]  }
  0x17   :  { %v104_v13 = vmax.f32 %v103_v12, 0.0  ;;  %v1507_v20 = vld [vmem:[#allocation2 + $0x30] sm:$0xff]   ;;  %v1512_v22 = vld [vmem:[#allocation2 + $0x78] sm:$0xff]   ;;  %v1524_v26 = vld [vmem:[%s1884_s2 + $0x40] sm:$0xff]  }
  0x18   :  { %1063 = vmatpush3.bf16.msra.mxu0 %v1459_v3  ;;  %1085 = vmatpush3.bf16.msra.mxu1 %v1459_v3  ;;  %v1517_v24 = vld [vmem:[#allocation2 + $0x38] sm:$0xff]   ;;  %v1534_v31 = vld [vmem:[%s1884_s2] sm:$0xff]   ;;  %v1541_v32 = vld [vmem:[%s1884_s2 + $0x48] sm:$0xff]  }
  0x19   :  { %1064 = vmatprep.subr.bf16.mxu0 %v1463_v4  ;;  %1086 = vmatprep.subr.bf16.mxu1 %v1463_v4  ;;  %v106_v15 = vcombine.high %v104_v13, %v104_v13  ;;  %v1496_v16 = vpack.c.bf16 %v104_v13, %v104_v13  ;;  %v102_v33 = vld [vmem:[%s1886_s4] sm:$0xf]  ;;  %v1553_v35 = vld [vmem:[%s1884_s2 + $0x8] sm:$0xff]   ;;  %v1563_v38 = vld [vmem:[%s1884_s2 + $0x50] sm:$0xff]  }
  0x1a   :  { %610 = vperm.xlu1 %1333, %v102_v33   ;;  %v101_v37 = vld [vmem:[%s1885_s3] sm:$0xf]  ;;  %v1570_v41 = vld [vmem:[%s1884_s2 + $0x10] sm:$0xff]   ;;  %v1577_v43 = vld [vmem:[%s1884_s2 + $0x58] sm:$0xff]  }
  0x1b   :  { %v1502_v18 = vpack.c.bf16 %v106_v15, %v106_v15  ;;  %v110_v19 = vunpack.c.l.bf16 %v1496_v16  ;;  %570 = vperm.xlu0 %1331, %v101_v37   ;;  %v1584_v46 = vld [vmem:[%s1884_s2 + $0x18] sm:$0xff]   ;;  %v1591_v47 = vld [vmem:[%s1884_s2 + $0x60] sm:$0xff]   ;;  %v1605_v49 = vld [vmem:[%s1884_s2 + $0x68] sm:$0xff]  }
  0x1c   :  { %1065 = vmatpush3.bf16.msra.mxu0 %v1467_v5  ;;  %1087 = vmatpush3.bf16.msra.mxu1 %v1467_v5  ;;  %v1598_v48 = vld [vmem:[%s1884_s2 + $0x20] sm:$0xff]   ;;  %v1612_v51 = vld [vmem:[%s1884_s2 + $0x28] sm:$0xff]   ;;  %v1619_v52 = vld [vmem:[%s1884_s2 + $0x70] sm:$0xff]  }
  0x1d   :  { %1066 = vmatprep.subr.bf16.mxu0 %v1471_v6  ;;  %1088 = vmatprep.subr.bf16.mxu1 %v1471_v6  ;;  %v111_v21 = vunpack.c.l.bf16 %v1502_v18  ;;  %v1626_v53 = vld [vmem:[%s1884_s2 + $0x30] sm:$0xff]   ;;  %v1633_v54 = vld [vmem:[%s1884_s2 + $0x78] sm:$0xff]   ;;  %v1057_v57 = vld [vmem:[%s1882_s0 + $0x8] sm:$0xff] }
  0x1e   :  { %302 = vmatprep.mubr.bf16.mxu1 %v1502_v18  ;;  %1334 = vset.pattern.permute.xlu1 %v1399_v40  ;;  %v1640_v55 = vld [vmem:[%s1884_s2 + $0x38] sm:$0xff]   ;;  %v671_v58 = vmax.f32 %v1057_v57, 0.0 }
  0x1f   :  { %v114_v23 = vcombine.low %v110_v19, %v111_v21  ;;  %619 = vperm.xlu1 %1334, %v102_v33   ;;  %1332 = vset.pattern.permute.xlu0 %v1399_v40 }
  0x20   :  { %1067 = vmatpush3.bf16.msra.mxu0 %v1475_v7  ;;  %1089 = vmatpush3.bf16.msra.mxu1 %v1475_v7  ;;  %v673_v59 = vcombine.high %v671_v58, %v671_v58  ;;  %v1665_v60 = vpack.c.bf16 %v671_v58, %v671_v58 }
  0x21   :  { %1068 = vmatprep.subr.bf16.mxu0 %v1479_v8  ;;  %1090 = vmatprep.subr.bf16.mxu1 %v1479_v8  ;;  %v116_v25 = vsub.f32 %v104_v13, %v114_v23 }
  0x22   :  { %579 = vperm.xlu0 %1332, %v101_v37   ;;  %v1667_v61 = vpack.c.bf16 %v673_v59, %v673_v59  ;;  %v677_v62 = vunpack.c.l.bf16 %v1665_v60 }
  0x23   :  { %v118_v27 = vcombine.high %v116_v25, %v116_v25  ;;  %v1526_v28 = vpack.c.bf16 %v116_v25, %v116_v25  ;;  %1335 = vset.pattern.permute.xlu1 %v1400_v45 }
  0x24   :  { %1069 = vmatpush3.bf16.msra.mxu0 %v1481_v10  ;;  %1091 = vmatpush3.bf16.msra.mxu1 %v1481_v10  ;;  %v678_v63 = vunpack.c.l.bf16 %v1667_v61 }
  0x25   :  { %1070 = vmatprep.subr.bf16.mxu0 %v1485_v11  ;;  %1092 = vmatprep.subr.bf16.mxu1 %v1485_v11  ;;  %v121_v29 = vpack.c.bf16 %v118_v27, %v118_v27  ;;  %v122_v30 = vunpack.c.l.bf16 %v1526_v28 }
  0x26   :  { %589 = vperm.xlu1 %1335, %v101_v37   ;;  %1336 = vset.pattern.permute.xlu0 %v1400_v45  ;;  %v681_v9 = vcombine.low %v677_v62, %v678_v63 }
  0x27   :  { %v123_v34 = vunpack.c.l.bf16 %v121_v29  ;;  %262 = vmatprep.mubr.bf16.mxu0 %v121_v29  ;;  %629 = vperm.xlu0 %1336, %v102_v33  }
  0x28   :  { %1071 = vmatpush3.bf16.msra.mxu0 %v1494_v14  ;;  %1093 = vmatpush3.bf16.msra.mxu1 %v1494_v14  ;;  %v683_v12 = vsub.f32 %v671_v58, %v681_v9 }
  0x29   :  { %1072 = vmatprep.subr.bf16.mxu0 %v1500_v17  ;;  %1094 = vmatprep.subr.bf16.mxu1 %v1500_v17  ;;  %v126_v36 = vcombine.low %v122_v30, %v123_v34 }
  0x2a   :  { %1337 = vset.pattern.permute.xlu1 %v1401_v50  ;;  %v685_v13 = vcombine.high %v683_v12, %v683_v12 }
  0x2b   :  { %v128_v39 = vsub.f32 %v116_v25, %v126_v36  ;;  %599 = vperm.xlu1 %1337, %v101_v37   ;;  %1338 = vset.pattern.permute.xlu0 %v1401_v50 }
  0x2c   :  { %1073 = vmatpush3.bf16.msra.mxu0 %v1507_v20  ;;  %1095 = vmatpush3.bf16.msra.mxu1 %v1507_v20  ;;  %v688_v15 = vpack.c.bf16 %v685_v13, %v685_v13 }
  0x2d   :  { %1074 = vmatprep.subr.bf16.mxu0 %v1512_v22  ;;  %1096 = vmatprep.subr.bf16.mxu1 %v1512_v22  ;;  %v130_v42 = vcombine.high %v128_v39, %v128_v39  ;;  %v132_v56 = vpack.c.bf16 %v128_v39, %v128_v39 }
  0x2f   :  { %v133_v44 = vpack.c.bf16 %v130_v42, %v130_v42  ;;  %639 = vperm.xlu1 %1337, %v102_v33  }
  0x30   :  { %1075 = vmatpush3.bf16.msra.mxu0 %v1517_v24  ;;  %1097 = vmatpush3.bf16.msra.mxu1 %v1517_v24 }
  0x31   :  { %1104 = vmatprep.subr.bf16.mxu0 %v1449_v0  ;;  %1126 = vmatprep.subr.bf16.mxu1 %v1524_v26 }
  0x33   :  { %263 = vmatmul.mubr.bf16.vlgmr.msra.gmra.mrb[0].mxu0 %v1526_v28  ;;  %303 = vmatmul.mubr.bf16.vlgmr.msra.gmra.mrb[0].mxu1 %v1496_v16 }
  0x34   :  { %1105 = vmatpush3.bf16.msra.mxu0 %v1451_v1  ;;  %1127 = vmatpush3.bf16.msra.mxu1 %v1534_v31 }
  0x35   :  { %1106 = vmatprep.subr.bf16.mxu0 %v1455_v2  ;;  %1128 = vmatprep.subr.bf16.mxu1 %v1541_v32 }
  0x36   :  { %479 = vmatprep.mubr.bf16.mxu1 %v121_v29  ;;  %342 = vmatprep.mubr.bf16.mxu0 %v133_v44 }
  0x38   :  { %1107 = vmatpush3.bf16.msra.mxu0 %v1459_v3  ;;  %1129 = vmatpush3.bf16.msra.mxu1 %v1553_v35 }
  0x39   :  { %1108 = vmatprep.subr.bf16.mxu0 %v1463_v4  ;;  %1130 = vmatprep.subr.bf16.mxu1 %v1563_v38 }
  0x3c   :  { %1109 = vmatpush3.bf16.msra.mxu0 %v1467_v5  ;;  %1131 = vmatpush3.bf16.msra.mxu1 %v1570_v41 }
  0x3d   :  { %1110 = vmatprep.subr.bf16.mxu0 %v1471_v6  ;;  %1132 = vmatprep.subr.bf16.mxu1 %v1577_v43 }
  0x40   :  { %1111 = vmatpush3.bf16.msra.mxu0 %v1475_v7  ;;  %1133 = vmatpush3.bf16.msra.mxu1 %v1584_v46 }
  0x41   :  { %1112 = vmatprep.subr.bf16.mxu0 %v1479_v8  ;;  %1134 = vmatprep.subr.bf16.mxu1 %v1591_v47 }
  0x44   :  { %1113 = vmatpush3.bf16.msra.mxu0 %v1481_v10  ;;  %1135 = vmatpush3.bf16.msra.mxu1 %v1598_v48 }
  0x45   :  { %1114 = vmatprep.subr.bf16.mxu0 %v1485_v11  ;;  %1136 = vmatprep.subr.bf16.mxu1 %v1605_v49 }
  0x48   :  { %1115 = vmatpush3.bf16.msra.mxu0 %v1494_v14  ;;  %1137 = vmatpush3.bf16.msra.mxu1 %v1612_v51 }
  0x49   :  { %1116 = vmatprep.subr.bf16.mxu0 %v1500_v17  ;;  %1138 = vmatprep.subr.bf16.mxu1 %v1619_v52 }
  0x4c   :  { %1117 = vmatpush3.bf16.msra.mxu0 %v1507_v20  ;;  %1139 = vmatpush3.bf16.msra.mxu1 %v1626_v53 }
  0x4d   :  { %1118 = vmatprep.subr.bf16.mxu0 %v1512_v22  ;;  %1140 = vmatprep.subr.bf16.mxu1 %v1633_v54 }
  0x50   :  { %1119 = vmatpush3.bf16.msra.mxu0 %v1517_v24  ;;  %1141 = vmatpush3.bf16.msra.mxu1 %v1640_v55 }
  0x51   :  { %1148 = vmatprep.subr.bf16.mxu0 %v1524_v26  ;;  %1170 = vmatprep.subr.bf16.mxu1 %v1524_v26 }
  0x53   :  { %343 = vmatmul.mubr.bf16.vlgmr.msra.gmra.mrb[4].mxu0 %v132_v56  ;;  %480 = vmatmul.mubr.bf16.vlgmr.msra.gmra.mrb[4].mxu1 %v1526_v28 }
  0x54   :  { %1149 = vmatpush3.bf16.msra.mxu0 %v1534_v31  ;;  %1171 = vmatpush3.bf16.msra.mxu1 %v1534_v31 }
  0x55   :  { %1150 = vmatprep.subr.bf16.mxu0 %v1541_v32  ;;  %1172 = vmatprep.subr.bf16.mxu1 %v1541_v32 }
  0x56   :  { %519 = vmatprep.mubr.bf16.mxu0 %v1502_v18  ;;  %559 = vmatprep.mubr.bf16.mxu1 %v133_v44  ;;  %v690_v18 = vunpack.c.l.bf16 %v688_v15 }
  0x58   :  { %1151 = vmatpush3.bf16.msra.mxu0 %v1553_v35  ;;  %1173 = vmatpush3.bf16.msra.mxu1 %v1553_v35 }
  0x59   :  { %1152 = vmatprep.subr.bf16.mxu0 %v1563_v38  ;;  %1174 = vmatprep.subr.bf16.mxu1 %v1563_v38 }
  0x5c   :  { %1153 = vmatpush3.bf16.msra.mxu0 %v1570_v41  ;;  %1175 = vmatpush3.bf16.msra.mxu1 %v1570_v41 }
  0x5d   :  { %1154 = vmatprep.subr.bf16.mxu0 %v1577_v43  ;;  %1176 = vmatprep.subr.bf16.mxu1 %v1577_v43 }
  0x60   :  { %1155 = vmatpush3.bf16.msra.mxu0 %v1584_v46  ;;  %1177 = vmatpush3.bf16.msra.mxu1 %v1584_v46 }
  0x61   :  { %1156 = vmatprep.subr.bf16.mxu0 %v1591_v47  ;;  %1178 = vmatprep.subr.bf16.mxu1 %v1591_v47 }
  0x64   :  { %1157 = vmatpush3.bf16.msra.mxu0 %v1598_v48  ;;  %1179 = vmatpush3.bf16.msra.mxu1 %v1598_v48 }
  0x65   :  { %1158 = vmatprep.subr.bf16.mxu0 %v1605_v49  ;;  %1180 = vmatprep.subr.bf16.mxu1 %v1605_v49 }
  0x68   :  { %1159 = vmatpush3.bf16.msra.mxu0 %v1612_v51  ;;  %1181 = vmatpush3.bf16.msra.mxu1 %v1612_v51 }
  0x69   :  { %1160 = vmatprep.subr.bf16.mxu0 %v1619_v52  ;;  %1182 = vmatprep.subr.bf16.mxu1 %v1619_v52 }
  0x6c   :  { %1161 = vmatpush3.bf16.msra.mxu0 %v1626_v53  ;;  %1183 = vmatpush3.bf16.msra.mxu1 %v1626_v53 }
  0x6d   :  { %1162 = vmatprep.subr.bf16.mxu0 %v1633_v54  ;;  %1184 = vmatprep.subr.bf16.mxu1 %v1633_v54 }
  0x70   :  { %1163 = vmatpush3.bf16.msra.mxu0 %v1640_v55  ;;  %1185 = vmatpush3.bf16.msra.mxu1 %v1640_v55 }
  0x71   :  { %1192 = vmatprep.subr.bf16.mxu0 %v1449_v0  ;;  %1214 = vmatprep.subr.bf16.mxu1 %v1449_v0 }
  0x73   :  { %520 = vmatmul.mubr.bf16.vlgmr.msra.gmra.mrb[8].mxu0 %v1496_v16  ;;  %560 = vmatmul.mubr.bf16.vlgmr.msra.gmra.mrb[8].mxu1 %v132_v56  ;;  %v687_v16 = vpack.c.bf16 %v683_v12, %v683_v12 }
  0x74   :  { %1193 = vmatpush3.bf16.msra.mxu0 %v1451_v1  ;;  %1215 = vmatpush3.bf16.msra.mxu1 %v1451_v1 }
  0x75   :  { %1194 = vmatprep.subr.bf16.mxu0 %v1455_v2  ;;  %1216 = vmatprep.subr.bf16.mxu1 %v1455_v2  ;;  %v689_v19 = vunpack.c.l.bf16 %v687_v16 }
  0x76   :  { %733 = vmatprep.mubr.bf16.mxu0 %v688_v15  ;;  %773 = vmatprep.mubr.bf16.mxu1 %v1667_v61 }
  0x77   :  { %v693_v21 = vcombine.low %v689_v19, %v690_v18 }
  0x78   :  { %1195 = vmatpush3.bf16.msra.mxu0 %v1459_v3  ;;  %1217 = vmatpush3.bf16.msra.mxu1 %v1459_v3 }
  0x79   :  { %1196 = vmatprep.subr.bf16.mxu0 %v1463_v4  ;;  %1218 = vmatprep.subr.bf16.mxu1 %v1463_v4  ;;  %v695_v23 = vsub.f32 %v683_v12, %v693_v21 }
  0x7b   :  { %v697_v25 = vcombine.high %v695_v23, %v695_v23 }
  0x7c   :  { %1197 = vmatpush3.bf16.msra.mxu0 %v1467_v5  ;;  %1219 = vmatpush3.bf16.msra.mxu1 %v1467_v5 }
  0x7d   :  { %1198 = vmatprep.subr.bf16.mxu0 %v1471_v6  ;;  %1220 = vmatprep.subr.bf16.mxu1 %v1471_v6  ;;  %v700_v27 = vpack.c.bf16 %v697_v25, %v697_v25 }
  0x80   :  { %1199 = vmatpush3.bf16.msra.mxu0 %v1475_v7  ;;  %1221 = vmatpush3.bf16.msra.mxu1 %v1475_v7 }
  0x81   :  { %1200 = vmatprep.subr.bf16.mxu0 %v1479_v8  ;;  %1222 = vmatprep.subr.bf16.mxu1 %v1479_v8 }
  0x84   :  { %1201 = vmatpush3.bf16.msra.mxu0 %v1481_v10  ;;  %1223 = vmatpush3.bf16.msra.mxu1 %v1481_v10 }
  0x85   :  { %1202 = vmatprep.subr.bf16.mxu0 %v1485_v11  ;;  %1224 = vmatprep.subr.bf16.mxu1 %v1485_v11 }
  0x88   :  { %1203 = vmatpush3.bf16.msra.mxu0 %v1494_v14  ;;  %1225 = vmatpush3.bf16.msra.mxu1 %v1494_v14 }
  0x89   :  { %1204 = vmatprep.subr.bf16.mxu0 %v1500_v17  ;;  %1226 = vmatprep.subr.bf16.mxu1 %v1500_v17 }
  0x8c   :  { %1205 = vmatpush3.bf16.msra.mxu0 %v1507_v20  ;;  %1227 = vmatpush3.bf16.msra.mxu1 %v1507_v20 }
  0x8d   :  { %1206 = vmatprep.subr.bf16.mxu0 %v1512_v22  ;;  %1228 = vmatprep.subr.bf16.mxu1 %v1512_v22 }
  0x90   :  { %1207 = vmatpush3.bf16.msra.mxu0 %v1517_v24  ;;  %1229 = vmatpush3.bf16.msra.mxu1 %v1517_v24 }
  0x91   :  { %1236 = vmatprep.subr.bf16.mxu0 %v1449_v0  ;;  %1258 = vmatprep.subr.bf16.mxu1 %v1524_v26  ;;  %v699_v0 = vpack.c.bf16 %v695_v23, %v695_v23 }
  0x93   :  { %734 = vmatmul.mubr.bf16.vlgmr.msra.gmra.mrb[12].mxu0 %v687_v16  ;;  %774 = vmatmul.mubr.bf16.vlgmr.msra.gmra.mrb[12].mxu1 %v1665_v60 }
  0x94   :  { %1237 = vmatpush3.bf16.msra.mxu0 %v1451_v1  ;;  %1259 = vmatpush3.bf16.msra.mxu1 %v1534_v31 }
  0x95   :  { %1238 = vmatprep.subr.bf16.mxu0 %v1455_v2  ;;  %1260 = vmatprep.subr.bf16.mxu1 %v1541_v32 }
  0x96   :  { %813 = vmatprep.mubr.bf16.mxu0 %v700_v27  ;;  %854 = vmatprep.mubr.bf16.mxu1 %v688_v15 }
  0x98   :  { %1239 = vmatpush3.bf16.msra.mxu0 %v1459_v3  ;;  %1261 = vmatpush3.bf16.msra.mxu1 %v1553_v35 }
  0x99   :  { %1240 = vmatprep.subr.bf16.mxu0 %v1463_v4  ;;  %1262 = vmatprep.subr.bf16.mxu1 %v1563_v38 }
  0x9a   :  { %v1796_v28 = vpop.permute.xlu0 %570 }
  0x9c   :  { %1241 = vmatpush3.bf16.msra.mxu0 %v1467_v5  ;;  %1263 = vmatpush3.bf16.msra.mxu1 %v1570_v41 }
  0x9d   :  { %1242 = vmatprep.subr.bf16.mxu0 %v1471_v6  ;;  %1264 = vmatprep.subr.bf16.mxu1 %v1577_v43 }
  0xa0   :  { %1243 = vmatpush3.bf16.msra.mxu0 %v1475_v7  ;;  %1265 = vmatpush3.bf16.msra.mxu1 %v1584_v46 }
  0xa1   :  { %1244 = vmatprep.subr.bf16.mxu0 %v1479_v8  ;;  %1266 = vmatprep.subr.bf16.mxu1 %v1591_v47  ;;  %v1806_v44 = vpop.permute.xlu0 %579 }
  0xa4   :  { %1245 = vmatpush3.bf16.msra.mxu0 %v1481_v10  ;;  %1267 = vmatpush3.bf16.msra.mxu1 %v1598_v48 }
  0xa5   :  { %1246 = vmatprep.subr.bf16.mxu0 %v1485_v11  ;;  %1268 = vmatprep.subr.bf16.mxu1 %v1605_v49 }
  0xa8   :  { %1247 = vmatpush3.bf16.msra.mxu0 %v1494_v14  ;;  %1269 = vmatpush3.bf16.msra.mxu1 %v1612_v51 }
  0xa9   :  { %1248 = vmatprep.subr.bf16.mxu0 %v1500_v17  ;;  %1270 = vmatprep.subr.bf16.mxu1 %v1619_v52  ;;  %v1790_v17 = vpop.permute.xlu1 %610 }
  0xac   :  { %1249 = vmatpush3.bf16.msra.mxu0 %v1507_v20  ;;  %1271 = vmatpush3.bf16.msra.mxu1 %v1626_v53 }
  0xad   :  { %1250 = vmatprep.subr.bf16.mxu0 %v1512_v22  ;;  %1272 = vmatprep.subr.bf16.mxu1 %v1633_v54  ;;  %v1792_v20 = vpop.permute.xlu1 %619  ;;  %v573_v22 = vlaneseq }
  0xb0   :  { %1251 = vmatpush3.bf16.msra.mxu0 %v1517_v24  ;;  %1273 = vmatpush3.bf16.msra.mxu1 %v1640_v55  ;;  %v574_v24 = vshrl.u32 %v573_v22, 7 }
  0xb1   :  { %1280 = vmatprep.subr.bf16.mxu0 %v1524_v26  ;;  %1302 = vmatprep.subr.bf16.mxu1 %v1524_v26  ;;  %v1794_v26 = vpop.permute.xlu1 %589 }
  0xb2   :  { %v1798_v33 = vsub.s32 2, %v574_v24  ;;  %v1802_v39 = vsub.s32 1, %v574_v24 }
  0xb3   :  { %814 = vmatmul.mubr.bf16.vlgmr.msra.gmra.mrb[16].mxu0 %v699_v0  ;;  %855 = vmatmul.mubr.bf16.vlgmr.msra.gmra.mrb[16].mxu1 %v687_v16 }
  0xb4   :  { %1281 = vmatpush3.bf16.msra.mxu0 %v1534_v31  ;;  %1303 = vmatpush3.bf16.msra.mxu1 %v1534_v31 }
  0xb5   :  { %1282 = vmatprep.subr.bf16.mxu0 %v1541_v32  ;;  %1304 = vmatprep.subr.bf16.mxu1 %v1541_v32 }
  0xb6   :  { %894 = vmatprep.mubr.bf16.mxu0 %v1667_v61  ;;  %934 = vmatprep.mubr.bf16.mxu1 %v700_v27 }
  0xb8   :  { %1283 = vmatpush3.bf16.msra.mxu0 %v1553_v35  ;;  %1305 = vmatpush3.bf16.msra.mxu1 %v1553_v35 }
  0xb9   :  { %1284 = vmatprep.subr.bf16.mxu0 %v1563_v38  ;;  %1306 = vmatprep.subr.bf16.mxu1 %v1563_v38  ;;  %v1800_v38 = vsub.s32 0, %v574_v24 }
  0xbc   :  { %1285 = vmatpush3.bf16.msra.mxu0 %v1570_v41  ;;  %1307 = vmatpush3.bf16.msra.mxu1 %v1570_v41 }
  0xbd   :  { %1286 = vmatprep.subr.bf16.mxu0 %v1577_v43  ;;  %1308 = vmatprep.subr.bf16.mxu1 %v1577_v43  ;;  %v1804_v43 = vsub.s32 3, %v574_v24 }
  0xc0   :  { %1287 = vmatpush3.bf16.msra.mxu0 %v1584_v46  ;;  %1309 = vmatpush3.bf16.msra.mxu1 %v1584_v46 }
  0xc1   :  { %1288 = vmatprep.subr.bf16.mxu0 %v1591_v47  ;;  %1310 = vmatprep.subr.bf16.mxu1 %v1591_v47 }
  0xc4   :  { %1289 = vmatpush3.bf16.msra.mxu0 %v1598_v48  ;;  %1311 = vmatpush3.bf16.msra.mxu1 %v1598_v48 }
  0xc5   :  { %1290 = vmatprep.subr.bf16.mxu0 %v1605_v49  ;;  %1312 = vmatprep.subr.bf16.mxu1 %v1605_v49 }
  0xc8   :  { %1291 = vmatpush3.bf16.msra.mxu0 %v1612_v51  ;;  %1313 = vmatpush3.bf16.msra.mxu1 %v1612_v51  ;;  %v1814_v51 = vpop.permute.xlu1 %599 }
  0xc9   :  { %1292 = vmatprep.subr.bf16.mxu0 %v1619_v52  ;;  %1314 = vmatprep.subr.bf16.mxu1 %v1619_v52 }
  0xcc   :  { %1293 = vmatpush3.bf16.msra.mxu0 %v1626_v53  ;;  %1315 = vmatpush3.bf16.msra.mxu1 %v1626_v53 }
  0xcd   :  { %1294 = vmatprep.subr.bf16.mxu0 %v1633_v54  ;;  %1316 = vmatprep.subr.bf16.mxu1 %v1633_v54 }
  0xd0   :  { %1295 = vmatpush3.bf16.msra.mxu0 %v1640_v55  ;;  %1317 = vmatpush3.bf16.msra.mxu1 %v1640_v55 }
  0xd3   :  { %895 = vmatmul.mubr.bf16.vlgmr.msra.gmra.mrb[20].mxu0 %v1665_v60  ;;  %935 = vmatmul.mubr.bf16.vlgmr.msra.gmra.mrb[20].mxu1 %v699_v0  ;;  %v1827_v0 = vpop.permute.xlu0 %629 }
 0x106   :  { %v1076_v1 = vpop.f32.mrb[0].mxu0  ;;  %v1098_v2 = vpop.f32.mrb[0].mxu1 }
 0x107   :  { %v1077_v3 = vpop.f32.mrb[1].mxu0  ;;  %v1099_v4 = vpop.f32.mrb[1].mxu1 }
 0x108   :  { %v1078_v5 = vadd.f32 %v1077_v3, %v1076_v1  ;;  %v1100_v6 = vadd.f32 %v1099_v4, %v1098_v2  ;;  %v1079_v7 = vpop.f32.mrb[2].mxu0  ;;  %v1101_v8 = vpop.f32.mrb[2].mxu1 }
 0x109   :  { %v1080_v10 = vpop.f32.mrb[3].mxu0  ;;  %v1102_v11 = vpop.f32.mrb[3].mxu1 }
 0x10a   :  { %v305_v14 = vadd.f32 %v1100_v6, %v1078_v5  ;;  %v1832_v4 = vpop.permute.xlu1 %639 }
 0x126   :  { %v1120_v29 = vpop.f32.mrb[4].mxu0  ;;  %v1142_v30 = vpop.f32.mrb[4].mxu1 }
 0x127   :  { %v1121_v31 = vpop.f32.mrb[5].mxu0  ;;  %v1143_v32 = vpop.f32.mrb[5].mxu1 }
 0x128   :  { %v1122_v34 = vadd.f32 %v1121_v31, %v1120_v29  ;;  %v1144_v35 = vadd.f32 %v1143_v32, %v1142_v30  ;;  %v1123_v36 = vpop.f32.mrb[6].mxu0  ;;  %v1145_v37 = vpop.f32.mrb[6].mxu1 }
 0x129   :  { %v1124_v40 = vpop.f32.mrb[7].mxu0  ;;  %v1146_v41 = vpop.f32.mrb[7].mxu1 }
 0x12a   :  { %v350_v42 = vadd.f32 %v1122_v34, %v305_v14 }
 0x12c   :  { %v595_v45 = vrot.slane %v350_v42, %v1798_v33  ;;  %v576_v46 = vrot.slane %v350_v42, %v1800_v38  ;;  %v585_v47 = vrot.slane %v350_v42, %v1802_v39  ;;  %v605_v49 = vrot.slane %v350_v42, %v1804_v43 }
 0x12e   :  { %v577_v48 = vmul.f32 %v576_v46, %v1796_v28  ;;  %v586_v50 = vmul.f32 %v585_v47, %v1806_v44  ;;  %v596_v52 = vmul.f32 %v595_v45, %v1794_v26  ;;  %v606_v54 = vmul.f32 %v605_v49, %v1814_v51 }
 0x130   :  { %v587_v53 = vadd.f32 %v586_v50, %v577_v48 }
 0x132   :  { %v597_v55 = vadd.f32 %v596_v52, %v587_v53 }
 0x134   :  { %v607_v56 = vadd.f32 %v606_v54, %v597_v55 }
 0x136   :  { %v651_v57 = vsel %vm648_vm0, %v607_v56, 0.0  ;;  %649 = vst.msk [vmem:[%s1887_s5] sm:$0xf] %vm648_vm0, %v607_v56  ;;  %v655_v58 = vmul.f32 %v607_v56, %v607_v56 }
 0x137   :  { %652 = vadd.xlane.f32.xlu0 %v651_v57 }
 0x138   :  { %v656_v59 = vsel %vm648_vm0, %v655_v58, 0.0 }
 0x139   :  { %657 = vadd.xlane.f32.xlu1 %v656_v59 }
 0x146   :  { %v1164_v60 = vpop.f32.mrb[8].mxu0  ;;  %v1186_v61 = vpop.f32.mrb[8].mxu1 }
 0x147   :  { %v1165_v62 = vpop.f32.mrb[9].mxu0  ;;  %v1187_v63 = vpop.f32.mrb[9].mxu1 }
 0x148   :  { %v1166_v9 = vadd.f32 %v1165_v62, %v1164_v60  ;;  %v1188_v12 = vadd.f32 %v1187_v63, %v1186_v61  ;;  %v1167_v13 = vpop.f32.mrb[10].mxu0  ;;  %v1189_v15 = vpop.f32.mrb[10].mxu1 }
 0x149   :  { %v1168_v16 = vpop.f32.mrb[11].mxu0  ;;  %v1190_v18 = vpop.f32.mrb[11].mxu1 }
 0x14a   :  { %v522_v19 = vadd.f32 %v1166_v9, %v1144_v35 }
 0x14c   :  { %v567_v21 = vadd.f32 %v1188_v12, %v522_v19 }
 0x14e   :  { %v616_v23 = vrot.slane %v567_v21, %v1800_v38  ;;  %v625_v25 = vrot.slane %v567_v21, %v1802_v39  ;;  %v635_v27 = vrot.slane %v567_v21, %v1798_v33  ;;  %v645_v1 = vrot.slane %v567_v21, %v1804_v43 }
 0x150   :  { %v617_v2 = vmul.f32 %v616_v23, %v1790_v17  ;;  %v626_v3 = vmul.f32 %v625_v25, %v1792_v20  ;;  %v636_v6 = vmul.f32 %v635_v27, %v1827_v0  ;;  %v646_v7 = vmul.f32 %v645_v1, %v1832_v4 }
 0x152   :  { %v627_v5 = vadd.f32 %v626_v3, %v617_v2 }
 0x154   :  { %v637_v8 = vadd.f32 %v636_v6, %v627_v5 }
 0x156   :  { %v647_v10 = vadd.f32 %v646_v7, %v637_v8 }
 0x158   :  { %650 = vst.msk [vmem:[%s1887_s5 + $0x4] sm:$0xf] %vm648_vm0, %v647_v10  ;;  %v660_v11 = vsel %vm648_vm0, %v647_v10, 0.0  ;;  %v664_v14 = vmul.f32 %v647_v10, %v647_v10 }
 0x159   :  { %661 = vadd.xlane.f32.xlu1 %v660_v11 }
 0x15a   :  { %v665_v22 = vsel %vm648_vm0, %v664_v14, 0.0 }
 0x15b   :  { %666 = vadd.xlane.f32.xlu0 %v665_v22 }
 0x166   :  { %v1208_v24 = vpop.f32.mrb[12].mxu0  ;;  %v1230_v29 = vpop.f32.mrb[12].mxu1 }
 0x167   :  { %v1209_v30 = vpop.f32.mrb[13].mxu0  ;;  %v1231_v31 = vpop.f32.mrb[13].mxu1 }
 0x168   :  { %v1210_v32 = vadd.f32 %v1209_v30, %v1208_v24  ;;  %v1232_v34 = vadd.f32 %v1231_v31, %v1230_v29  ;;  %v1211_v35 = vpop.f32.mrb[14].mxu0  ;;  %v1233_v36 = vpop.f32.mrb[14].mxu1 }
 0x169   :  { %v1212_v37 = vpop.f32.mrb[15].mxu0  ;;  %v1234_v40 = vpop.f32.mrb[15].mxu1 }
 0x16a   :  { %v776_v41 = vadd.f32 %v1232_v34, %v1210_v32 }
 0x186   :  { %v1252_v42 = vpop.f32.mrb[16].mxu0  ;;  %v1274_v45 = vpop.f32.mrb[16].mxu1 }
 0x187   :  { %v1253_v46 = vpop.f32.mrb[17].mxu0  ;;  %v1275_v47 = vpop.f32.mrb[17].mxu1 }
 0x188   :  { %v1254_v48 = vadd.f32 %v1253_v46, %v1252_v42  ;;  %v1276_v49 = vadd.f32 %v1275_v47, %v1274_v45  ;;  %v1255_v50 = vpop.f32.mrb[18].mxu0  ;;  %v1277_v52 = vpop.f32.mrb[18].mxu1 }
 0x189   :  { %v1256_v53 = vpop.f32.mrb[19].mxu0  ;;  %v1278_v54 = vpop.f32.mrb[19].mxu1 }
 0x18a   :  { %v821_v55 = vadd.f32 %v1254_v48, %v776_v41 }
 0x18c   :  { %v946_v56 = vrot.slane %v821_v55, %v1800_v38  ;;  %v951_v57 = vrot.slane %v821_v55, %v1802_v39  ;;  %v957_v58 = vrot.slane %v821_v55, %v1798_v33  ;;  %v963_v61 = vrot.slane %v821_v55, %v1804_v43 }
 0x18e   :  { %v947_v59 = vmul.f32 %v946_v56, %v1796_v28  ;;  %v952_v60 = vmul.f32 %v951_v57, %v1806_v44  ;;  %v958_v63 = vmul.f32 %v957_v58, %v1794_v26  ;;  %v964_v12 = vmul.f32 %v963_v61, %v1814_v51 }
 0x190   :  { %v953_v62 = vadd.f32 %v952_v60, %v947_v59 }
 0x192   :  { %v959_v9 = vadd.f32 %v958_v63, %v953_v62 }
 0x194   :  { %v965_v13 = vadd.f32 %v964_v12, %v959_v9 }
 0x196   :  { %1058 = vst.msk [vmem:[%s1887_s5 + $0x8] sm:$0xf] %vm648_vm0, %v965_v13  ;;  %v992_v15 = vsel %vm648_vm0, %v965_v13, 0.0  ;;  %v996_v16 = vmul.f32 %v965_v13, %v965_v13 }
 0x197   :  { %993 = vadd.xlane.f32.xlu0 %v992_v15 }
 0x198   :  { %v997_v28 = vsel %vm648_vm0, %v996_v16, 0.0 }
 0x199   :  { %998 = vadd.xlane.f32.xlu1 %v997_v28 }
 0x1a6   :  { %v1296_v44 = vpop.f32.mrb[20].mxu0  ;;  %v1318_v18 = vpop.f32.mrb[20].mxu1 }
 0x1a7   :  { %v1297_v19 = vpop.f32.mrb[21].mxu0  ;;  %v1319_v26 = vpop.f32.mrb[21].mxu1 }
 0x1a8   :  { %v1298_v21 = vadd.f32 %v1297_v19, %v1296_v44  ;;  %v1320_v23 = vadd.f32 %v1319_v26, %v1318_v18  ;;  %v1299_v51 = vpop.f32.mrb[22].mxu0  ;;  %v1321_v25 = vpop.f32.mrb[22].mxu1 }
 0x1a9   :  { %v1300_v27 = vpop.f32.mrb[23].mxu0  ;;  %v1322_v1 = vpop.f32.mrb[23].mxu1 }
 0x1aa   :  { %v897_v2 = vadd.f32 %v1298_v21, %v1276_v49 }
 0x1ac   :  { %v942_v3 = vadd.f32 %v1320_v23, %v897_v2 }
 0x1ae   :  { %v969_v5 = vrot.slane %v942_v3, %v1800_v38  ;;  %v974_v6 = vrot.slane %v942_v3, %v1802_v39  ;;  %v980_v7 = vrot.slane %v942_v3, %v1798_v33  ;;  %v986_v11 = vrot.slane %v942_v3, %v1804_v43 }
 0x1b0   :  { %v970_v8 = vmul.f32 %v969_v5, %v1790_v17  ;;  %v975_v10 = vmul.f32 %v974_v6, %v1792_v20  ;;  %v981_v22 = vmul.f32 %v980_v7, %v1827_v0  ;;  %v987_v29 = vmul.f32 %v986_v11, %v1832_v4 }
 0x1b2   :  { %v976_v14 = vadd.f32 %v975_v10, %v970_v8 }
 0x1b4   :  { %v982_v24 = vadd.f32 %v981_v22, %v976_v14 }
 0x1b6   :  { %v988_v30 = vadd.f32 %v987_v29, %v982_v24 }
 0x1b8   :  { %1059 = vst.msk [vmem:[%s1887_s5 + $0xc] sm:$0xf] %vm648_vm0, %v988_v30  ;;  %v1001_v33 = vsel %vm648_vm0, %v988_v30, 0.0  ;;  %v1005_v38 = vmul.f32 %v988_v30, %v988_v30 }
 0x1b9   :  { %1002 = vadd.xlane.f32.xlu0 %v1001_v33 }
 0x1ba   :  { %v1006_v17 = vsel %vm648_vm0, %v1005_v38, 0.0 }
 0x1bd   :  { %1007 = vadd.xlane.f32.xlu0 %v1006_v17 }
 0x1c4   :  { %v653_v20 = vpop.xlane.xlu0 %652 }
 0x1c6   :  { %v658_v39 = vpop.xlane.xlu1 %657 }
 0x1e6   :  { %v662_v0 = vpop.xlane.xlu1 %661 }
 0x1e8   :  { %v667_v43 = vpop.xlane.xlu0 %666 }
 0x224   :  { %v994_v31 = vpop.xlane.xlu0 %993 }
 0x225   :  { %v995_v4 = vadd.f32 %v994_v31, %v653_v20 }
 0x226   :  { %v999_v32 = vpop.xlane.xlu1 %998 }
 0x227   :  { %1011 = vst.msk [vmem:[%s1888_s6] sm:$0xf] %vm1010_vm1, %v995_v4  ;;  %v1000_v34 = vadd.f32 %v999_v32, %v658_v39 }
 0x229   :  { %1014 = vst.msk [vmem:[%s1888_s6] sm:$0xf] %vm1013_vm2, %v1000_v34 }
 0x246   :  { %v1003_v35 = vpop.xlane.xlu0 %1002 }
 0x247   :  { %v1004_v36 = vadd.f32 %v1003_v35, %v662_v0 }
 0x249   :  { %1012 = vst.msk [vmem:[%s1888_s6 + $0x4] sm:$0xf] %vm1010_vm1, %v1004_v36 }
 0x24a   :  { %v1008_v37 = vpop.xlane.xlu0 %1007 }
 0x24b   :  { %v1009_v40 = vadd.f32 %v1008_v37, %v667_v43 }
 0x24d   :  { %1015 = vst.msk [vmem:[%s1888_s6 + $0x4] sm:$0xf] %vm1013_vm2, %v1009_v40 }
 0x24e   :  { %1024 = vsyncpa [#allocation3], 1 }

</bundles_post_ra>
